<compile_context>
chip_gen: v7x
topology: tpu7x:2x2x1
jax: 0.10.0
libtpu: 0.0.40
codegen_flags: <defaults>
</compile_context>

<pallas_src>
import functools
import numpy as np
import jax
import jax.numpy as jnp
from jax import lax
from jax.experimental import pallas as pl
from jax.experimental.pallas import tpu as pltpu


def _mha_kernel(q_ref, k_ref, v_ref,
                wq_ref, bq_ref, wk_ref, bk_ref, wv_ref, bv_ref,
                lnp_ref, gq_ref, bgq_ref, gk_ref, bgk_ref,
                wo_ref, bo_ref,
                out_ref, aw_ref, sc_ref,
                *, n_heads, d_head, eps):
    """One grid step = (batch element, query tile).

    Shapes seen by the kernel (tq = query tile length, L = full key length):
      q_ref            : (1, tq, d_model)
      k_ref / v_ref    : (1, L,  d_model)
      wq/wk/wv_ref     : (d_model, H*Dh)     fused across heads
      bq/bk/bv_ref     : (1, H*Dh)
      lnp_ref          : (H*Dh, H*Dh)        block-diag per-head mean-pooling matrix
      gq/bgq/gk/bgk    : (1, H*Dh)           LayerNorm gamma/beta tiled over heads
      wo_ref           : (H*Dh, d_model)     fused output projection
      bo_ref           : (1, d_model)
      out_ref          : (1, tq, d_model)
      aw_ref / sc_ref  : (1, H, tq, L)
    """
    H, Dh = n_heads, d_head
    scale = 1.0 / float(np.sqrt(Dh))

    x_q = q_ref[0]   # (tq, d_model)
    x_k = k_ref[0]   # (L,  d_model)
    x_v = v_ref[0]   # (L,  d_model)

    # --- fused (lane-dense) Q/K/V projections: one MXU matmul each -----------
    q_all = jnp.dot(x_q, wq_ref[...], preferred_element_type=jnp.float32) + bq_ref[0]
    k_all = jnp.dot(x_k, wk_ref[...], preferred_element_type=jnp.float32) + bk_ref[0]
    v_all = jnp.dot(x_v, wv_ref[...], preferred_element_type=jnp.float32) + bv_ref[0]

    # --- per-head LayerNorm on the fused layout -------------------------------
    # lnp is block-diagonal with 1/Dh inside each head's (Dh, Dh) block, so
    # x @ lnp broadcasts the per-head mean to every column of that head.
    lnp = lnp_ref[...]

    def grouped_layer_norm(x, gamma, beta):
        mu = jnp.dot(x, lnp, preferred_element_type=jnp.float32)
        xc = x - mu
        var = jnp.dot(xc * xc, lnp, preferred_element_type=jnp.float32)
        return xc * lax.rsqrt(var + eps) * gamma + beta

    # Fold the 1/sqrt(d_head) attention scale into the normalized queries.
    q_all = grouped_layer_norm(q_all, gq_ref[0], bgq_ref[0]) * scale
    k_all = grouped_layer_norm(k_all, gk_ref[0], bgk_ref[0])

    # --- per-head scaled dot-product attention --------------------------------
    # Static loop over heads (H is small); slices are static lane slices of the
    # fused activations, so no dynamic lane indexing is needed.
    ctx = []
    for h in range(H):
        lo = h * Dh
        qh = q_all[:, lo:lo + Dh]      # (tq, Dh)
        kh = k_all[:, lo:lo + Dh]      # (L,  Dh)
        vh = v_all[:, lo:lo + Dh]      # (L,  Dh)

        # scores = qh @ kh.T without materializing a transposed copy of kh.
        s = lax.dot_general(qh, kh, (((1,), (1,)), ((), ())),
                            preferred_element_type=jnp.float32)   # (tq, L)
        sc_ref[0, h] = s

        m = jnp.max(s, axis=-1, keepdims=True)
        e = jnp.exp(s - m)
        w = e * pl.reciprocal(jnp.sum(e, axis=-1, keepdims=True), approx=True)
        aw_ref[0, h] = w

        ctx.append(jnp.dot(w, vh, preferred_element_type=jnp.float32))  # (tq, Dh)

    # --- fused output projection: one (tq, H*Dh) x (H*Dh, d_model) matmul -----
    ctx_all = jnp.concatenate(ctx, axis=-1)
    out_ref[0] = (jnp.dot(ctx_all, wo_ref[...], preferred_element_type=jnp.float32)
                  + bo_ref[0])


def _pick_q_tile(L):
    """Query-tile length: full L for short sequences, else a divisor <= 256."""
    if L <= 256:
        return L
    for t in (256, 128, 64, 32, 16, 8):
        if L % t == 0:
            return t
    return L


def multi_head_attention(emb_q, emb_k, emb_v, params, *, n_heads, d_head, eps=1e-5):
    """JAX wrapper: builds the grid/BlockSpecs and invokes the fused kernel."""
    B, L, d_model = emb_q.shape
    H, Dh = n_heads, d_head
    tq = _pick_q_tile(L)
    n_q = L // tq

    kernel = functools.partial(_mha_kernel, n_heads=H, d_head=Dh, eps=eps)

    q_spec = pl.BlockSpec((1, tq, d_model), lambda b, qi: (b, qi, 0))
    kv_spec = pl.BlockSpec((1, L, d_model), lambda b, qi: (b, 0, 0))
    w_spec = pl.BlockSpec((d_model, H * Dh), lambda b, qi: (0, 0))
    b_spec = pl.BlockSpec((1, H * Dh), lambda b, qi: (0, 0))
    lnp_spec = pl.BlockSpec((H * Dh, H * Dh), lambda b, qi: (0, 0))
    wo_spec = pl.BlockSpec((H * Dh, d_model), lambda b, qi: (0, 0))
    bo_spec = pl.BlockSpec((1, d_model), lambda b, qi: (0, 0))

    out_specs = (
        pl.BlockSpec((1, tq, d_model), lambda b, qi: (b, qi, 0)),
        pl.BlockSpec((1, H, tq, L), lambda b, qi: (b, 0, qi, 0)),
        pl.BlockSpec((1, H, tq, L), lambda b, qi: (b, 0, qi, 0)),
    )
    out_shape = (
        jax.ShapeDtypeStruct((B, L, d_model), jnp.float32),
        jax.ShapeDtypeStruct((B, H, L, L), jnp.float32),
        jax.ShapeDtypeStruct((B, H, L, L), jnp.float32),
    )

    # Rough per-step VMEM footprint (double-buffered IO + params + temporaries),
    # used to raise the scoped-VMEM ceiling when shapes are large.
    f = 4
    io_bytes = ((tq + 2 * L) * d_model + tq * d_model + 2 * H * tq * L) * f
    param_bytes = (3 * d_model * H * Dh + (H * Dh) ** 2 + H * Dh * d_model
                   + 8 * H * Dh + 2 * d_model) * f
    inter_bytes = 6 * max(tq, L) * H * Dh * f
    vmem_limit = int(max(32 * 2 ** 20,
                         min(2 * io_bytes + param_bytes + inter_bytes + 2 ** 20,
                             96 * 2 ** 20)))

    return pl.pallas_call(
        kernel,
        out_shape=out_shape,
        grid_spec=pltpu.PrefetchScalarGridSpec(
            num_scalar_prefetch=0,
            grid=(B, n_q),
            in_specs=[
                q_spec, kv_spec, kv_spec,
                w_spec, b_spec,        # W_q
                w_spec, b_spec,        # W_k
                w_spec, b_spec,        # W_v
                lnp_spec,              # per-head pooling matrix
                b_spec, b_spec,        # norm_q gamma / beta (tiled)
                b_spec, b_spec,        # norm_k gamma / beta (tiled)
                wo_spec, bo_spec,      # proj
            ],
            out_specs=out_specs,
        ),
        compiler_params=pltpu.CompilerParams(
            dimension_semantics=("parallel", "parallel"),
            vmem_limit_bytes=vmem_limit),
    )(
        emb_q, emb_k, emb_v,
        params["wq"], params["bq"],
        params["wk"], params["bk"],
        params["wv"], params["bv"],
        params["lnp"],
        params["gq"], params["bgq"],
        params["gk"], params["bgk"],
        params["wo"], params["bo"],
    )


def init_params(key, d_model, n_heads, d_head):
    """Deterministic parameter init mirroring the PyTorch module.

    nn.Linear weights: trunc_normal(std=0.02), biases zero.
    LayerNorm gamma=1, beta=0.
    """
    H, Dh = n_heads, d_head
    ks = jax.random.split(key, 4)

    def trunc_normal(k, shape):
        return 0.02 * jax.random.truncated_normal(k, -2.0 / 0.02, 2.0 / 0.02,
                                                  shape, jnp.float32)

    # nn.Linear weight layout is (out_features, in_features); y = x @ W.T + b.
    wq_t = trunc_normal(ks[0], (H * Dh, d_model))
    wk_t = trunc_normal(ks[1], (H * Dh, d_model))
    wv_t = trunc_normal(ks[2], (H * Dh, d_model))
    wo_t = trunc_normal(ks[3], (d_model, H * Dh))   # proj linear

    # Block-diagonal per-head mean-pooling matrix: 1/Dh within each head block.
    idx = np.arange(H * Dh)
    lnp = (idx[:, None] // Dh == idx[None, :] // Dh).astype(np.float32) / float(Dh)

    params = {
        # Fused projection weights, applied on the right: (d_model, H*Dh).
        "wq": wq_t.T, "bq": jnp.zeros((1, H * Dh), jnp.float32),
        "wk": wk_t.T, "bk": jnp.zeros((1, H * Dh), jnp.float32),
        "wv": wv_t.T, "bv": jnp.zeros((1, H * Dh), jnp.float32),
        "lnp": jnp.asarray(lnp),
        # LayerNorm affine params tiled across heads -> (1, H*Dh).
        "gq": jnp.tile(jnp.ones((1, Dh), jnp.float32), (1, H)),
        "bgq": jnp.tile(jnp.zeros((1, Dh), jnp.float32), (1, H)),
        "gk": jnp.tile(jnp.ones((1, Dh), jnp.float32), (1, H)),
        "bgk": jnp.tile(jnp.zeros((1, Dh), jnp.float32), (1, H)),
        # Fused output projection: (H*Dh, d_model).
        "wo": wo_t.T, "bo": jnp.zeros((1, d_model), jnp.float32),
    }
    # Keep the dense PyTorch-layout forms for the pure-JAX reference check.
    params["_wq_t"], params["_wk_t"], params["_wv_t"], params["_wo_t"] = wq_t, wk_t, wv_t, wo_t
    return params


def reference_forward(emb_q, emb_k, emb_v, params, n_heads, d_head, eps=1e-5):
    """Pure-JAX mirror of the PyTorch forward, for verification."""
    B, L, d_model = emb_q.shape
    H, Dh = n_heads, d_head

    def proj_heads(x, w_t):
        y = x @ w_t.T                                                # (B, L, H*Dh)
        return jnp.transpose(y.reshape(B, L, H, Dh), (0, 2, 1, 3))   # (B, H, L, Dh)

    def ln(x):
        mu = jnp.mean(x, axis=-1, keepdims=True)
        var = jnp.mean((x - mu) ** 2, axis=-1, keepdims=True)
        return (x - mu) / jnp.sqrt(var + eps)

    q = ln(proj_heads(emb_q, params["_wq_t"]))
    k = ln(proj_heads(emb_k, params["_wk_t"]))
    v = proj_heads(emb_v, params["_wv_t"])

    scale = 1.0 / np.sqrt(Dh)
    score = jnp.einsum("bhqd,bhkd->bhqk", q, k) * scale
    weight = jax.nn.softmax(score, axis=-1)
    emb = jnp.einsum("bhqk,bhkd->bhqd", weight, v)
    emb = jnp.transpose(emb, (0, 2, 1, 3)).reshape(B, L, H * Dh)
    out = emb @ params["_wo_t"].T
    return out, weight, score


if __name__ == "__main__":
    # Small shapes consistent with the module's forward signature.
    B, L, d_model = 2, 8, 32
    n_heads, d_head = 4, 8

    key = jax.random.PRNGKey(0)
    k_p, k_q, k_k, k_v = jax.random.split(key, 4)
    params = init_params(k_p, d_model, n_heads, d_head)

    emb_q = jax.random.normal(k_q, (B, L, d_model), jnp.float32)
    emb_k = jax.random.normal(k_k, (B, L, d_model), jnp.float32)
    emb_v = jax.random.normal(k_v, (B, L, d_model), jnp.float32)

    out, attn_weight, attn_score = multi_head_attention(
        emb_q, emb_k, emb_v, params, n_heads=n_heads, d_head=d_head)
    jax.block_until_ready((out, attn_weight, attn_score))

    # Sanity-check against the pure-JAX reference (tolerance loosened slightly
    # for the EUP approx reciprocal in the softmax denominator).
    ref_out, ref_w, ref_s = reference_forward(
        emb_q, emb_k, emb_v, params, n_heads, d_head)
    assert np.allclose(np.asarray(out), np.asarray(ref_out), atol=1e-3, rtol=1e-3)
    assert np.allclose(np.asarray(attn_weight), np.asarray(ref_w), atol=1e-3, rtol=1e-3)
    assert np.allclose(np.asarray(attn_score), np.asarray(ref_s), atol=1e-3, rtol=1e-3)

    print("KERNEL_OK")
</pallas_src>

<mosaic_0001>
module attributes {stable_mosaic.version = 11 : i64} {
  func.func @_mha_kernel(%arg0: i32, %arg1: i32, %arg2: memref<1x8x32xf32, #tpu.memory_space<vmem>>, %arg3: memref<1x8x32xf32, #tpu.memory_space<vmem>>, %arg4: memref<1x8x32xf32, #tpu.memory_space<vmem>>, %arg5: memref<32x32xf32, #tpu.memory_space<vmem>>, %arg6: memref<1x32xf32, #tpu.memory_space<vmem>>, %arg7: memref<32x32xf32, #tpu.memory_space<vmem>>, %arg8: memref<1x32xf32, #tpu.memory_space<vmem>>, %arg9: memref<32x32xf32, #tpu.memory_space<vmem>>, %arg10: memref<1x32xf32, #tpu.memory_space<vmem>>, %arg11: memref<32x32xf32, #tpu.memory_space<vmem>>, %arg12: memref<1x32xf32, #tpu.memory_space<vmem>>, %arg13: memref<1x32xf32, #tpu.memory_space<vmem>>, %arg14: memref<1x32xf32, #tpu.memory_space<vmem>>, %arg15: memref<1x32xf32, #tpu.memory_space<vmem>>, %arg16: memref<32x32xf32, #tpu.memory_space<vmem>>, %arg17: memref<1x32xf32, #tpu.memory_space<vmem>>, %arg18: memref<1x8x32xf32, #tpu.memory_space<vmem>>, %arg19: memref<1x4x8x8xf32, #tpu.memory_space<vmem>>, %arg20: memref<1x4x8x8xf32, #tpu.memory_space<vmem>>) attributes {dimension_semantics = [#tpu.dimension_semantics<parallel>, #tpu.dimension_semantics<parallel>], iteration_bounds = array<i64: 2, 1>, scalar_prefetch = 0 : i64, scratch_operands = 0 : i64, tpu.core_type = #tpu.core_type<tc>, window_params = [{transform_indices = @transform_0, window_bounds = array<i64: 1, 8, 32>}, {transform_indices = @transform_1, window_bounds = array<i64: 1, 8, 32>}, {transform_indices = @transform_2, window_bounds = array<i64: 1, 8, 32>}, {pipeline_mode = #tpu.pipeline_mode<synchronous>, transform_indices = @transform_3, window_bounds = array<i64: 32, 32>}, {pipeline_mode = #tpu.pipeline_mode<synchronous>, transform_indices = @transform_4, window_bounds = array<i64: 1, 32>}, {pipeline_mode = #tpu.pipeline_mode<synchronous>, transform_indices = @transform_5, window_bounds = array<i64: 32, 32>}, {pipeline_mode = #tpu.pipeline_mode<synchronous>, transform_indices = @transform_6, window_bounds = array<i64: 1, 32>}, {pipeline_mode = #tpu.pipeline_mode<synchronous>, transform_indices = @transform_7, window_bounds = array<i64: 32, 32>}, {pipeline_mode = #tpu.pipeline_mode<synchronous>, transform_indices = @transform_8, window_bounds = array<i64: 1, 32>}, {pipeline_mode = #tpu.pipeline_mode<synchronous>, transform_indices = @transform_9, window_bounds = array<i64: 32, 32>}, {pipeline_mode = #tpu.pipeline_mode<synchronous>, transform_indices = @transform_10, window_bounds = array<i64: 1, 32>}, {pipeline_mode = #tpu.pipeline_mode<synchronous>, transform_indices = @transform_11, window_bounds = array<i64: 1, 32>}, {pipeline_mode = #tpu.pipeline_mode<synchronous>, transform_indices = @transform_12, window_bounds = array<i64: 1, 32>}, {pipeline_mode = #tpu.pipeline_mode<synchronous>, transform_indices = @transform_13, window_bounds = array<i64: 1, 32>}, {pipeline_mode = #tpu.pipeline_mode<synchronous>, transform_indices = @transform_14, window_bounds = array<i64: 32, 32>}, {pipeline_mode = #tpu.pipeline_mode<synchronous>, transform_indices = @transform_15, window_bounds = array<i64: 1, 32>}, {transform_indices = @transform_16, window_bounds = array<i64: 1, 8, 32>}, {transform_indices = @transform_17, window_bounds = array<i64: 1, 4, 8, 8>}, {transform_indices = @transform_18, window_bounds = array<i64: 1, 4, 8, 8>}]} {
    %c0 = arith.constant 0 : index
    %c0_0 = arith.constant 0 : index
    %c0_1 = arith.constant 0 : index
    %0 = vector.load %arg2[%c0, %c0_0, %c0_1] : memref<1x8x32xf32, #tpu.memory_space<vmem>>, vector<1x8x32xf32>
    %1 = vector.shape_cast %0 : vector<1x8x32xf32> to vector<8x32xf32>
    %c0_2 = arith.constant 0 : index
    %c0_3 = arith.constant 0 : index
    %c0_4 = arith.constant 0 : index
    %2 = vector.load %arg3[%c0_2, %c0_3, %c0_4] : memref<1x8x32xf32, #tpu.memory_space<vmem>>, vector<1x8x32xf32>
    %3 = vector.shape_cast %2 : vector<1x8x32xf32> to vector<8x32xf32>
    %c0_5 = arith.constant 0 : index
    %c0_6 = arith.constant 0 : index
    %c0_7 = arith.constant 0 : index
    %4 = vector.load %arg4[%c0_5, %c0_6, %c0_7] : memref<1x8x32xf32, #tpu.memory_space<vmem>>, vector<1x8x32xf32>
    %5 = vector.shape_cast %4 : vector<1x8x32xf32> to vector<8x32xf32>
    %c0_8 = arith.constant 0 : index
    %c0_9 = arith.constant 0 : index
    %6 = vector.load %arg5[%c0_8, %c0_9] : memref<32x32xf32, #tpu.memory_space<vmem>>, vector<32x32xf32>
    %cst = arith.constant dense<0.000000e+00> : vector<8x32xf32>
    %7 = tpu.matmul %1, %6, %cst {dimension_numbers = #tpu.dot_dimension_numbers<[1], [0], [0], [1], [0, 0, 1, 1], [], []>} : vector<8x32xf32>, vector<32x32xf32>, vector<8x32xf32> -> vector<8x32xf32>
    %c0_10 = arith.constant 0 : index
    %c0_11 = arith.constant 0 : index
    %8 = vector.load %arg6[%c0_10, %c0_11] : memref<1x32xf32, #tpu.memory_space<vmem>>, vector<1x32xf32>
    %9 = vector.shape_cast %8 : vector<1x32xf32> to vector<32xf32>
    %10 = vector.shape_cast %9 : vector<32xf32> to vector<1x32xf32>
    %11 = vector.broadcast %10 : vector<1x32xf32> to vector<8x32xf32>
    %12 = arith.addf %7, %11 : vector<8x32xf32>
    %c0_12 = arith.constant 0 : index
    %c0_13 = arith.constant 0 : index
    %13 = vector.load %arg7[%c0_12, %c0_13] : memref<32x32xf32, #tpu.memory_space<vmem>>, vector<32x32xf32>
    %cst_14 = arith.constant dense<0.000000e+00> : vector<8x32xf32>
    %14 = tpu.matmul %3, %13, %cst_14 {dimension_numbers = #tpu.dot_dimension_numbers<[1], [0], [0], [1], [0, 0, 1, 1], [], []>} : vector<8x32xf32>, vector<32x32xf32>, vector<8x32xf32> -> vector<8x32xf32>
    %c0_15 = arith.constant 0 : index
    %c0_16 = arith.constant 0 : index
    %15 = vector.load %arg8[%c0_15, %c0_16] : memref<1x32xf32, #tpu.memory_space<vmem>>, vector<1x32xf32>
    %16 = vector.shape_cast %15 : vector<1x32xf32> to vector<32xf32>
    %17 = vector.shape_cast %16 : vector<32xf32> to vector<1x32xf32>
    %18 = vector.broadcast %17 : vector<1x32xf32> to vector<8x32xf32>
    %19 = arith.addf %14, %18 : vector<8x32xf32>
    %c0_17 = arith.constant 0 : index
    %c0_18 = arith.constant 0 : index
    %20 = vector.load %arg9[%c0_17, %c0_18] : memref<32x32xf32, #tpu.memory_space<vmem>>, vector<32x32xf32>
    %cst_19 = arith.constant dense<0.000000e+00> : vector<8x32xf32>
    %21 = tpu.matmul %5, %20, %cst_19 {dimension_numbers = #tpu.dot_dimension_numbers<[1], [0], [0], [1], [0, 0, 1, 1], [], []>} : vector<8x32xf32>, vector<32x32xf32>, vector<8x32xf32> -> vector<8x32xf32>
    %c0_20 = arith.constant 0 : index
    %c0_21 = arith.constant 0 : index
    %22 = vector.load %arg10[%c0_20, %c0_21] : memref<1x32xf32, #tpu.memory_space<vmem>>, vector<1x32xf32>
    %23 = vector.shape_cast %22 : vector<1x32xf32> to vector<32xf32>
    %24 = vector.shape_cast %23 : vector<32xf32> to vector<1x32xf32>
    %25 = vector.broadcast %24 : vector<1x32xf32> to vector<8x32xf32>
    %26 = arith.addf %21, %25 : vector<8x32xf32>
    %c0_22 = arith.constant 0 : index
    %c0_23 = arith.constant 0 : index
    %27 = vector.load %arg11[%c0_22, %c0_23] : memref<32x32xf32, #tpu.memory_space<vmem>>, vector<32x32xf32>
    %c0_24 = arith.constant 0 : index
    %c0_25 = arith.constant 0 : index
    %28 = vector.load %arg12[%c0_24, %c0_25] : memref<1x32xf32, #tpu.memory_space<vmem>>, vector<1x32xf32>
    %29 = vector.shape_cast %28 : vector<1x32xf32> to vector<32xf32>
    %c0_26 = arith.constant 0 : index
    %c0_27 = arith.constant 0 : index
    %30 = vector.load %arg13[%c0_26, %c0_27] : memref<1x32xf32, #tpu.memory_space<vmem>>, vector<1x32xf32>
    %31 = vector.shape_cast %30 : vector<1x32xf32> to vector<32xf32>
    %cst_28 = arith.constant dense<0.000000e+00> : vector<8x32xf32>
    %32 = tpu.matmul %12, %27, %cst_28 {dimension_numbers = #tpu.dot_dimension_numbers<[1], [0], [0], [1], [0, 0, 1, 1], [], []>} : vector<8x32xf32>, vector<32x32xf32>, vector<8x32xf32> -> vector<8x32xf32>
    %33 = arith.subf %12, %32 : vector<8x32xf32>
    %34 = arith.mulf %33, %33 : vector<8x32xf32>
    %cst_29 = arith.constant dense<0.000000e+00> : vector<8x32xf32>
    %35 = tpu.matmul %34, %27, %cst_29 {dimension_numbers = #tpu.dot_dimension_numbers<[1], [0], [0], [1], [0, 0, 1, 1], [], []>} : vector<8x32xf32>, vector<32x32xf32>, vector<8x32xf32> -> vector<8x32xf32>
    %cst_30 = arith.constant 9.99999974E-6 : f32
    %36 = vector.broadcast %cst_30 : f32 to vector<8x32xf32>
    %37 = arith.addf %35, %36 : vector<8x32xf32>
    %38 = math.rsqrt %37 : vector<8x32xf32>
    %39 = arith.mulf %33, %38 : vector<8x32xf32>
    %40 = vector.shape_cast %29 : vector<32xf32> to vector<1x32xf32>
    %41 = vector.broadcast %40 : vector<1x32xf32> to vector<8x32xf32>
    %42 = arith.mulf %39, %41 : vector<8x32xf32>
    %43 = vector.shape_cast %31 : vector<32xf32> to vector<1x32xf32>
    %44 = vector.broadcast %43 : vector<1x32xf32> to vector<8x32xf32>
    %45 = arith.addf %42, %44 : vector<8x32xf32>
    %cst_31 = arith.constant 0.353553385 : f32
    %46 = vector.broadcast %cst_31 : f32 to vector<8x32xf32>
    %47 = arith.mulf %45, %46 : vector<8x32xf32>
    %c0_32 = arith.constant 0 : index
    %c0_33 = arith.constant 0 : index
    %48 = vector.load %arg14[%c0_32, %c0_33] : memref<1x32xf32, #tpu.memory_space<vmem>>, vector<1x32xf32>
    %49 = vector.shape_cast %48 : vector<1x32xf32> to vector<32xf32>
    %c0_34 = arith.constant 0 : index
    %c0_35 = arith.constant 0 : index
    %50 = vector.load %arg15[%c0_34, %c0_35] : memref<1x32xf32, #tpu.memory_space<vmem>>, vector<1x32xf32>
    %51 = vector.shape_cast %50 : vector<1x32xf32> to vector<32xf32>
    %cst_36 = arith.constant dense<0.000000e+00> : vector<8x32xf32>
    %52 = tpu.matmul %19, %27, %cst_36 {dimension_numbers = #tpu.dot_dimension_numbers<[1], [0], [0], [1], [0, 0, 1, 1], [], []>} : vector<8x32xf32>, vector<32x32xf32>, vector<8x32xf32> -> vector<8x32xf32>
    %53 = arith.subf %19, %52 : vector<8x32xf32>
    %54 = arith.mulf %53, %53 : vector<8x32xf32>
    %cst_37 = arith.constant dense<0.000000e+00> : vector<8x32xf32>
    %55 = tpu.matmul %54, %27, %cst_37 {dimension_numbers = #tpu.dot_dimension_numbers<[1], [0], [0], [1], [0, 0, 1, 1], [], []>} : vector<8x32xf32>, vector<32x32xf32>, vector<8x32xf32> -> vector<8x32xf32>
    %cst_38 = arith.constant 9.99999974E-6 : f32
    %56 = vector.broadcast %cst_38 : f32 to vector<8x32xf32>
    %57 = arith.addf %55, %56 : vector<8x32xf32>
    %58 = math.rsqrt %57 : vector<8x32xf32>
    %59 = arith.mulf %53, %58 : vector<8x32xf32>
    %60 = vector.shape_cast %49 : vector<32xf32> to vector<1x32xf32>
    %61 = vector.broadcast %60 : vector<1x32xf32> to vector<8x32xf32>
    %62 = arith.mulf %59, %61 : vector<8x32xf32>
    %63 = vector.shape_cast %51 : vector<32xf32> to vector<1x32xf32>
    %64 = vector.broadcast %63 : vector<1x32xf32> to vector<8x32xf32>
    %65 = arith.addf %62, %64 : vector<8x32xf32>
    %66 = vector.extract_strided_slice %47 {offsets = [0, 0], sizes = [8, 8], strides = [1, 1]} : vector<8x32xf32> to vector<8x8xf32>
    %67 = vector.extract_strided_slice %65 {offsets = [0, 0], sizes = [8, 8], strides = [1, 1]} : vector<8x32xf32> to vector<8x8xf32>
    %68 = vector.extract_strided_slice %26 {offsets = [0, 0], sizes = [8, 8], strides = [1, 1]} : vector<8x32xf32> to vector<8x8xf32>
    %cst_39 = arith.constant dense<0.000000e+00> : vector<8x8xf32>
    %69 = tpu.matmul %66, %67, %cst_39 {dimension_numbers = #tpu.dot_dimension_numbers<[1], [1], [0], [0], [0, 0, 1, 0], [], []>} : vector<8x8xf32>, vector<8x8xf32>, vector<8x8xf32> -> vector<8x8xf32>
    %c0_40 = arith.constant 0 : index
    %c0_41 = arith.constant 0 : index
    %c0_42 = arith.constant 0 : index
    %c0_43 = arith.constant 0 : index
    %70 = vector.load %arg20[%c0_40, %c0_41, %c0_42, %c0_43] : memref<1x4x8x8xf32, #tpu.memory_space<vmem>>, vector<1x1x8x8xf32>
    %71 = vector.shape_cast %70 : vector<1x1x8x8xf32> to vector<8x8xf32>
    %72 = vector.shape_cast %69 : vector<8x8xf32> to vector<1x1x8x8xf32>
    tpu.vector_store %arg20[%c0_40, %c0_41, %c0_42, %c0_43], %72 {strides = array<i32>} : memref<1x4x8x8xf32, #tpu.memory_space<vmem>>, vector<1x1x8x8xf32>,
    %cst_44 = arith.constant dense<0xFF800000> : vector<8xf32>
    %73 = vector.multi_reduction <maximumf>, %69, %cst_44 [1] : vector<8x8xf32> to vector<8xf32>
    %74 = vector.shape_cast %73 : vector<8xf32> to vector<8x1xf32>
    %75 = vector.broadcast %74 : vector<8x1xf32> to vector<8x8xf32>
    %76 = arith.subf %69, %75 : vector<8x8xf32>
    %77 = math.exp %76 : vector<8x8xf32>
    %cst_45 = arith.constant dense<0.000000e+00> : vector<8xf32>
    %78 = vector.multi_reduction <add>, %77, %cst_45 [1] : vector<8x8xf32> to vector<8xf32>
    %79 = vector.shape_cast %78 : vector<8xf32> to vector<8x1xf32>
    %80 = tpu.reciprocal %79 {approx = true} : vector<8x1xf32> -> vector<8x1xf32>
    %81 = vector.broadcast %80 : vector<8x1xf32> to vector<8x8xf32>
    %82 = arith.mulf %77, %81 : vector<8x8xf32>
    %c0_46 = arith.constant 0 : index
    %c0_47 = arith.constant 0 : index
    %c0_48 = arith.constant 0 : index
    %c0_49 = arith.constant 0 : index
    %83 = vector.load %arg19[%c0_46, %c0_47, %c0_48, %c0_49] : memref<1x4x8x8xf32, #tpu.memory_space<vmem>>, vector<1x1x8x8xf32>
    %84 = vector.shape_cast %83 : vector<1x1x8x8xf32> to vector<8x8xf32>
    %85 = vector.shape_cast %82 : vector<8x8xf32> to vector<1x1x8x8xf32>
    tpu.vector_store %arg19[%c0_46, %c0_47, %c0_48, %c0_49], %85 {strides = array<i32>} : memref<1x4x8x8xf32, #tpu.memory_space<vmem>>, vector<1x1x8x8xf32>,
    %cst_50 = arith.constant dense<0.000000e+00> : vector<8x8xf32>
    %86 = tpu.matmul %82, %68, %cst_50 {dimension_numbers = #tpu.dot_dimension_numbers<[1], [0], [0], [1], [0, 0, 1, 1], [], []>} : vector<8x8xf32>, vector<8x8xf32>, vector<8x8xf32> -> vector<8x8xf32>
    %87 = vector.extract_strided_slice %47 {offsets = [0, 8], sizes = [8, 8], strides = [1, 1]} : vector<8x32xf32> to vector<8x8xf32>
    %88 = vector.extract_strided_slice %65 {offsets = [0, 8], sizes = [8, 8], strides = [1, 1]} : vector<8x32xf32> to vector<8x8xf32>
    %89 = vector.extract_strided_slice %26 {offsets = [0, 8], sizes = [8, 8], strides = [1, 1]} : vector<8x32xf32> to vector<8x8xf32>
    %cst_51 = arith.constant dense<0.000000e+00> : vector<8x8xf32>
    %90 = tpu.matmul %87, %88, %cst_51 {dimension_numbers = #tpu.dot_dimension_numbers<[1], [1], [0], [0], [0, 0, 1, 0], [], []>} : vector<8x8xf32>, vector<8x8xf32>, vector<8x8xf32> -> vector<8x8xf32>
    %c0_52 = arith.constant 0 : index
    %c1 = arith.constant 1 : index
    %c0_53 = arith.constant 0 : index
    %c0_54 = arith.constant 0 : index
    %91 = vector.load %arg20[%c0_52, %c1, %c0_53, %c0_54] : memref<1x4x8x8xf32, #tpu.memory_space<vmem>>, vector<1x1x8x8xf32>
    %92 = vector.shape_cast %91 : vector<1x1x8x8xf32> to vector<8x8xf32>
    %93 = vector.shape_cast %90 : vector<8x8xf32> to vector<1x1x8x8xf32>
    tpu.vector_store %arg20[%c0_52, %c1, %c0_53, %c0_54], %93 {strides = array<i32>} : memref<1x4x8x8xf32, #tpu.memory_space<vmem>>, vector<1x1x8x8xf32>,
    %cst_55 = arith.constant dense<0xFF800000> : vector<8xf32>
    %94 = vector.multi_reduction <maximumf>, %90, %cst_55 [1] : vector<8x8xf32> to vector<8xf32>
    %95 = vector.shape_cast %94 : vector<8xf32> to vector<8x1xf32>
    %96 = vector.broadcast %95 : vector<8x1xf32> to vector<8x8xf32>
    %97 = arith.subf %90, %96 : vector<8x8xf32>
    %98 = math.exp %97 : vector<8x8xf32>
    %cst_56 = arith.constant dense<0.000000e+00> : vector<8xf32>
    %99 = vector.multi_reduction <add>, %98, %cst_56 [1] : vector<8x8xf32> to vector<8xf32>
    %100 = vector.shape_cast %99 : vector<8xf32> to vector<8x1xf32>
    %101 = tpu.reciprocal %100 {approx = true} : vector<8x1xf32> -> vector<8x1xf32>
    %102 = vector.broadcast %101 : vector<8x1xf32> to vector<8x8xf32>
    %103 = arith.mulf %98, %102 : vector<8x8xf32>
    %c0_57 = arith.constant 0 : index
    %c1_58 = arith.constant 1 : index
    %c0_59 = arith.constant 0 : index
    %c0_60 = arith.constant 0 : index
    %104 = vector.load %arg19[%c0_57, %c1_58, %c0_59, %c0_60] : memref<1x4x8x8xf32, #tpu.memory_space<vmem>>, vector<1x1x8x8xf32>
    %105 = vector.shape_cast %104 : vector<1x1x8x8xf32> to vector<8x8xf32>
    %106 = vector.shape_cast %103 : vector<8x8xf32> to vector<1x1x8x8xf32>
    tpu.vector_store %arg19[%c0_57, %c1_58, %c0_59, %c0_60], %106 {strides = array<i32>} : memref<1x4x8x8xf32, #tpu.memory_space<vmem>>, vector<1x1x8x8xf32>,
    %cst_61 = arith.constant dense<0.000000e+00> : vector<8x8xf32>
    %107 = tpu.matmul %103, %89, %cst_61 {dimension_numbers = #tpu.dot_dimension_numbers<[1], [0], [0], [1], [0, 0, 1, 1], [], []>} : vector<8x8xf32>, vector<8x8xf32>, vector<8x8xf32> -> vector<8x8xf32>
    %108 = vector.extract_strided_slice %47 {offsets = [0, 16], sizes = [8, 8], strides = [1, 1]} : vector<8x32xf32> to vector<8x8xf32>
    %109 = vector.extract_strided_slice %65 {offsets = [0, 16], sizes = [8, 8], strides = [1, 1]} : vector<8x32xf32> to vector<8x8xf32>
    %110 = vector.extract_strided_slice %26 {offsets = [0, 16], sizes = [8, 8], strides = [1, 1]} : vector<8x32xf32> to vector<8x8xf32>
    %cst_62 = arith.constant dense<0.000000e+00> : vector<8x8xf32>
    %111 = tpu.matmul %108, %109, %cst_62 {dimension_numbers = #tpu.dot_dimension_numbers<[1], [1], [0], [0], [0, 0, 1, 0], [], []>} : vector<8x8xf32>, vector<8x8xf32>, vector<8x8xf32> -> vector<8x8xf32>
    %c0_63 = arith.constant 0 : index
    %c2 = arith.constant 2 : index
    %c0_64 = arith.constant 0 : index
    %c0_65 = arith.constant 0 : index
    %112 = vector.load %arg20[%c0_63, %c2, %c0_64, %c0_65] : memref<1x4x8x8xf32, #tpu.memory_space<vmem>>, vector<1x1x8x8xf32>
    %113 = vector.shape_cast %112 : vector<1x1x8x8xf32> to vector<8x8xf32>
    %114 = vector.shape_cast %111 : vector<8x8xf32> to vector<1x1x8x8xf32>
    tpu.vector_store %arg20[%c0_63, %c2, %c0_64, %c0_65], %114 {strides = array<i32>} : memref<1x4x8x8xf32, #tpu.memory_space<vmem>>, vector<1x1x8x8xf32>,
    %cst_66 = arith.constant dense<0xFF800000> : vector<8xf32>
    %115 = vector.multi_reduction <maximumf>, %111, %cst_66 [1] : vector<8x8xf32> to vector<8xf32>
    %116 = vector.shape_cast %115 : vector<8xf32> to vector<8x1xf32>
    %117 = vector.broadcast %116 : vector<8x1xf32> to vector<8x8xf32>
    %118 = arith.subf %111, %117 : vector<8x8xf32>
    %119 = math.exp %118 : vector<8x8xf32>
    %cst_67 = arith.constant dense<0.000000e+00> : vector<8xf32>
    %120 = vector.multi_reduction <add>, %119, %cst_67 [1] : vector<8x8xf32> to vector<8xf32>
    %121 = vector.shape_cast %120 : vector<8xf32> to vector<8x1xf32>
    %122 = tpu.reciprocal %121 {approx = true} : vector<8x1xf32> -> vector<8x1xf32>
    %123 = vector.broadcast %122 : vector<8x1xf32> to vector<8x8xf32>
    %124 = arith.mulf %119, %123 : vector<8x8xf32>
    %c0_68 = arith.constant 0 : index
    %c2_69 = arith.constant 2 : index
    %c0_70 = arith.constant 0 : index
    %c0_71 = arith.constant 0 : index
    %125 = vector.load %arg19[%c0_68, %c2_69, %c0_70, %c0_71] : memref<1x4x8x8xf32, #tpu.memory_space<vmem>>, vector<1x1x8x8xf32>
    %126 = vector.shape_cast %125 : vector<1x1x8x8xf32> to vector<8x8xf32>
    %127 = vector.shape_cast %124 : vector<8x8xf32> to vector<1x1x8x8xf32>
    tpu.vector_store %arg19[%c0_68, %c2_69, %c0_70, %c0_71], %127 {strides = array<i32>} : memref<1x4x8x8xf32, #tpu.memory_space<vmem>>, vector<1x1x8x8xf32>,
    %cst_72 = arith.constant dense<0.000000e+00> : vector<8x8xf32>
    %128 = tpu.matmul %124, %110, %cst_72 {dimension_numbers = #tpu.dot_dimension_numbers<[1], [0], [0], [1], [0, 0, 1, 1], [], []>} : vector<8x8xf32>, vector<8x8xf32>, vector<8x8xf32> -> vector<8x8xf32>
    %129 = vector.extract_strided_slice %47 {offsets = [0, 24], sizes = [8, 8], strides = [1, 1]} : vector<8x32xf32> to vector<8x8xf32>
    %130 = vector.extract_strided_slice %65 {offsets = [0, 24], sizes = [8, 8], strides = [1, 1]} : vector<8x32xf32> to vector<8x8xf32>
    %131 = vector.extract_strided_slice %26 {offsets = [0, 24], sizes = [8, 8], strides = [1, 1]} : vector<8x32xf32> to vector<8x8xf32>
    %cst_73 = arith.constant dense<0.000000e+00> : vector<8x8xf32>
    %132 = tpu.matmul %129, %130, %cst_73 {dimension_numbers = #tpu.dot_dimension_numbers<[1], [1], [0], [0], [0, 0, 1, 0], [], []>} : vector<8x8xf32>, vector<8x8xf32>, vector<8x8xf32> -> vector<8x8xf32>
    %c0_74 = arith.constant 0 : index
    %c3 = arith.constant 3 : index
    %c0_75 = arith.constant 0 : index
    %c0_76 = arith.constant 0 : index
    %133 = vector.load %arg20[%c0_74, %c3, %c0_75, %c0_76] : memref<1x4x8x8xf32, #tpu.memory_space<vmem>>, vector<1x1x8x8xf32>
    %134 = vector.shape_cast %133 : vector<1x1x8x8xf32> to vector<8x8xf32>
    %135 = vector.shape_cast %132 : vector<8x8xf32> to vector<1x1x8x8xf32>
    tpu.vector_store %arg20[%c0_74, %c3, %c0_75, %c0_76], %135 {strides = array<i32>} : memref<1x4x8x8xf32, #tpu.memory_space<vmem>>, vector<1x1x8x8xf32>,
    %cst_77 = arith.constant dense<0xFF800000> : vector<8xf32>
    %136 = vector.multi_reduction <maximumf>, %132, %cst_77 [1] : vector<8x8xf32> to vector<8xf32>
    %137 = vector.shape_cast %136 : vector<8xf32> to vector<8x1xf32>
    %138 = vector.broadcast %137 : vector<8x1xf32> to vector<8x8xf32>
    %139 = arith.subf %132, %138 : vector<8x8xf32>
    %140 = math.exp %139 : vector<8x8xf32>
    %cst_78 = arith.constant dense<0.000000e+00> : vector<8xf32>
    %141 = vector.multi_reduction <add>, %140, %cst_78 [1] : vector<8x8xf32> to vector<8xf32>
    %142 = vector.shape_cast %141 : vector<8xf32> to vector<8x1xf32>
    %143 = tpu.reciprocal %142 {approx = true} : vector<8x1xf32> -> vector<8x1xf32>
    %144 = vector.broadcast %143 : vector<8x1xf32> to vector<8x8xf32>
    %145 = arith.mulf %140, %144 : vector<8x8xf32>
    %c0_79 = arith.constant 0 : index
    %c3_80 = arith.constant 3 : index
    %c0_81 = arith.constant 0 : index
    %c0_82 = arith.constant 0 : index
    %146 = vector.load %arg19[%c0_79, %c3_80, %c0_81, %c0_82] : memref<1x4x8x8xf32, #tpu.memory_space<vmem>>, vector<1x1x8x8xf32>
    %147 = vector.shape_cast %146 : vector<1x1x8x8xf32> to vector<8x8xf32>
    %148 = vector.shape_cast %145 : vector<8x8xf32> to vector<1x1x8x8xf32>
    tpu.vector_store %arg19[%c0_79, %c3_80, %c0_81, %c0_82], %148 {strides = array<i32>} : memref<1x4x8x8xf32, #tpu.memory_space<vmem>>, vector<1x1x8x8xf32>,
    %cst_83 = arith.constant dense<0.000000e+00> : vector<8x8xf32>
    %149 = tpu.matmul %145, %131, %cst_83 {dimension_numbers = #tpu.dot_dimension_numbers<[1], [0], [0], [1], [0, 0, 1, 1], [], []>} : vector<8x8xf32>, vector<8x8xf32>, vector<8x8xf32> -> vector<8x8xf32>
    %150 = tpu.concatenate %86, %107, %128, %149 in 1 : vector<8x8xf32>, vector<8x8xf32>, vector<8x8xf32>, vector<8x8xf32> -> vector<8x32xf32>
    %c0_84 = arith.constant 0 : index
    %c0_85 = arith.constant 0 : index
    %151 = vector.load %arg16[%c0_84, %c0_85] : memref<32x32xf32, #tpu.memory_space<vmem>>, vector<32x32xf32>
    %cst_86 = arith.constant dense<0.000000e+00> : vector<8x32xf32>
    %152 = tpu.matmul %150, %151, %cst_86 {dimension_numbers = #tpu.dot_dimension_numbers<[1], [0], [0], [1], [0, 0, 1, 1], [], []>} : vector<8x32xf32>, vector<32x32xf32>, vector<8x32xf32> -> vector<8x32xf32>
    %c0_87 = arith.constant 0 : index
    %c0_88 = arith.constant 0 : index
    %153 = vector.load %arg17[%c0_87, %c0_88] : memref<1x32xf32, #tpu.memory_space<vmem>>, vector<1x32xf32>
    %154 = vector.shape_cast %153 : vector<1x32xf32> to vector<32xf32>
    %155 = vector.shape_cast %154 : vector<32xf32> to vector<1x32xf32>
    %156 = vector.broadcast %155 : vector<1x32xf32> to vector<8x32xf32>
    %157 = arith.addf %152, %156 : vector<8x32xf32>
    %c0_89 = arith.constant 0 : index
    %c0_90 = arith.constant 0 : index
    %c0_91 = arith.constant 0 : index
    %158 = vector.load %arg18[%c0_89, %c0_90, %c0_91] : memref<1x8x32xf32, #tpu.memory_space<vmem>>, vector<1x8x32xf32>
    %159 = vector.shape_cast %158 : vector<1x8x32xf32> to vector<8x32xf32>
    %160 = vector.shape_cast %157 : vector<8x32xf32> to vector<1x8x32xf32>
    tpu.vector_store %arg18[%c0_89, %c0_90, %c0_91], %160 {strides = array<i32>} : memref<1x8x32xf32, #tpu.memory_space<vmem>>, vector<1x8x32xf32>,
    return
  }
  func.func @transform_0(%arg0: i32, %arg1: i32) -> (i32, i32, i32) {
    %c0_i32 = arith.constant 0 : i32
    %c0_i32_0 = arith.constant 0 : i32
    return %arg0, %arg1, %c0_i32 : i32, i32, i32
  }
  func.func @transform_1(%arg0: i32, %arg1: i32) -> (i32, i32, i32) {
    %c0_i32 = arith.constant 0 : i32
    %c0_i32_0 = arith.constant 0 : i32
    %c0_i32_1 = arith.constant 0 : i32
    return %arg0, %c0_i32, %c0_i32_0 : i32, i32, i32
  }
  func.func @transform_2(%arg0: i32, %arg1: i32) -> (i32, i32, i32) {
    %c0_i32 = arith.constant 0 : i32
    %c0_i32_0 = arith.constant 0 : i32
    %c0_i32_1 = arith.constant 0 : i32
    return %arg0, %c0_i32, %c0_i32_0 : i32, i32, i32
  }
  func.func @transform_3(%arg0: i32, %arg1: i32) -> (i32, i32) {
    %c0_i32 = arith.constant 0 : i32
    %c0_i32_0 = arith.constant 0 : i32
    %c0_i32_1 = arith.constant 0 : i32
    return %c0_i32, %c0_i32_0 : i32, i32
  }
  func.func @transform_4(%arg0: i32, %arg1: i32) -> (i32, i32) {
    %c0_i32 = arith.constant 0 : i32
    %c0_i32_0 = arith.constant 0 : i32
    %c0_i32_1 = arith.constant 0 : i32
    return %c0_i32, %c0_i32_0 : i32, i32
  }
  func.func @transform_5(%arg0: i32, %arg1: i32) -> (i32, i32) {
    %c0_i32 = arith.constant 0 : i32
    %c0_i32_0 = arith.constant 0 : i32
    %c0_i32_1 = arith.constant 0 : i32
    return %c0_i32, %c0_i32_0 : i32, i32
  }
  func.func @transform_6(%arg0: i32, %arg1: i32) -> (i32, i32) {
    %c0_i32 = arith.constant 0 : i32
    %c0_i32_0 = arith.constant 0 : i32
    %c0_i32_1 = arith.constant 0 : i32
    return %c0_i32, %c0_i32_0 : i32, i32
  }
  func.func @transform_7(%arg0: i32, %arg1: i32) -> (i32, i32) {
    %c0_i32 = arith.constant 0 : i32
    %c0_i32_0 = arith.constant 0 : i32
    %c0_i32_1 = arith.constant 0 : i32
    return %c0_i32, %c0_i32_0 : i32, i32
  }
  func.func @transform_8(%arg0: i32, %arg1: i32) -> (i32, i32) {
    %c0_i32 = arith.constant 0 : i32
    %c0_i32_0 = arith.constant 0 : i32
    %c0_i32_1 = arith.constant 0 : i32
    return %c0_i32, %c0_i32_0 : i32, i32
  }
  func.func @transform_9(%arg0: i32, %arg1: i32) -> (i32, i32) {
    %c0_i32 = arith.constant 0 : i32
    %c0_i32_0 = arith.constant 0 : i32
    %c0_i32_1 = arith.constant 0 : i32
    return %c0_i32, %c0_i32_0 : i32, i32
  }
  func.func @transform_10(%arg0: i32, %arg1: i32) -> (i32, i32) {
    %c0_i32 = arith.constant 0 : i32
    %c0_i32_0 = arith.constant 0 : i32
    %c0_i32_1 = arith.constant 0 : i32
    return %c0_i32, %c0_i32_0 : i32, i32
  }
  func.func @transform_11(%arg0: i32, %arg1: i32) -> (i32, i32) {
    %c0_i32 = arith.constant 0 : i32
    %c0_i32_0 = arith.constant 0 : i32
    %c0_i32_1 = arith.constant 0 : i32
    return %c0_i32, %c0_i32_0 : i32, i32
  }
  func.func @transform_12(%arg0: i32, %arg1: i32) -> (i32, i32) {
    %c0_i32 = arith.constant 0 : i32
    %c0_i32_0 = arith.constant 0 : i32
    %c0_i32_1 = arith.constant 0 : i32
    return %c0_i32, %c0_i32_0 : i32, i32
  }
  func.func @transform_13(%arg0: i32, %arg1: i32) -> (i32, i32) {
    %c0_i32 = arith.constant 0 : i32
    %c0_i32_0 = arith.constant 0 : i32
    %c0_i32_1 = arith.constant 0 : i32
    return %c0_i32, %c0_i32_0 : i32, i32
  }
  func.func @transform_14(%arg0: i32, %arg1: i32) -> (i32, i32) {
    %c0_i32 = arith.constant 0 : i32
    %c0_i32_0 = arith.constant 0 : i32
    %c0_i32_1 = arith.constant 0 : i32
    return %c0_i32, %c0_i32_0 : i32, i32
  }
  func.func @transform_15(%arg0: i32, %arg1: i32) -> (i32, i32) {
    %c0_i32 = arith.constant 0 : i32
    %c0_i32_0 = arith.constant 0 : i32
    %c0_i32_1 = arith.constant 0 : i32
    return %c0_i32, %c0_i32_0 : i32, i32
  }
  func.func @transform_16(%arg0: i32, %arg1: i32) -> (i32, i32, i32) {
    %c0_i32 = arith.constant 0 : i32
    %c0_i32_0 = arith.constant 0 : i32
    return %arg0, %arg1, %c0_i32 : i32, i32, i32
  }
  func.func @transform_17(%arg0: i32, %arg1: i32) -> (i32, i32, i32, i32) {
    %c0_i32 = arith.constant 0 : i32
    %c0_i32_0 = arith.constant 0 : i32
    %c0_i32_1 = arith.constant 0 : i32
    return %arg0, %c0_i32, %arg1, %c0_i32_0 : i32, i32, i32, i32
  }
  func.func @transform_18(%arg0: i32, %arg1: i32) -> (i32, i32, i32, i32) {
    %c0_i32 = arith.constant 0 : i32
    %c0_i32_0 = arith.constant 0 : i32
    %c0_i32_1 = arith.constant 0 : i32
    return %arg0, %c0_i32, %arg1, %c0_i32_0 : i32, i32, i32, i32
  }
}

</mosaic_0001>

<bundles_post_ra>
// kernel: tpu_custom_call.1
= control target key start
LH: loop header
LB: loop body
LE: loop exit
PB: predicated region body
PF: predicated region fallthrough
CT: control target
= control target key end

     0   :  { %s4061_s0 = inlined_call_operand.hbm [shape: f32[2,8,32], index: 0, kind: input, shape index: {}]   ;;  %s4062_s1 = inlined_call_operand.hbm [shape: f32[2,8,32], index: 1, kind: input, shape index: {}]   ;;  %s4063_s2 = inlined_call_operand.hbm [shape: f32[2,8,32], index: 2, kind: input, shape index: {}]   ;;  %s4064_s3 = inlined_call_operand.hbm [shape: f32[32,32], index: 3, kind: input, shape index: {}]   ;;  %s4065_s4 = inlined_call_operand.vmem [shape: f32[1,32], index: 4, kind: input, shape index: {}]   ;;  %s4066_s5 = inlined_call_operand.hbm [shape: f32[32,32], index: 5, kind: input, shape index: {}]   ;;  %s4067_s6 = inlined_call_operand.vmem [shape: f32[1,32], index: 6, kind: input, shape index: {}]   ;;  %s4068_s7 = inlined_call_operand.hbm [shape: f32[32,32], index: 7, kind: input, shape index: {}]   ;;  %s4069_s8 = inlined_call_operand.hbm [shape: f32[1,32], index: 8, kind: input, shape index: {}]   ;;  %s4070_s9 = inlined_call_operand.vmem [shape: f32[32,32], index: 9, kind: input, shape index: {}]   ;;  %s4071_s10 = inlined_call_operand.vmem [shape: f32[1,32], index: 10, kind: input, shape index: {}]   ;;  %s4072_s11 = inlined_call_operand.vmem [shape: f32[1,32], index: 11, kind: input, shape index: {}]   ;;  %s4073_s12 = inlined_call_operand.vmem [shape: f32[1,32], index: 12, kind: input, shape index: {}]   ;;  %s4074_s13 = inlined_call_operand.vmem [shape: f32[1,32], index: 13, kind: input, shape index: {}]   ;;  %s4075_s14 = inlined_call_operand.hbm [shape: f32[32,32], index: 14, kind: input, shape index: {}]   ;;  %s4076_s15 = inlined_call_operand.vmem [shape: f32[1,32], index: 15, kind: input, shape index: {}]   ;;  %s4077_s16 = inlined_call_operand.hbm [shape: f32[2,8,32], index: 16, kind: output, shape index: {0}]   ;;  %s4078_s17 = inlined_call_operand.hbm [shape: f32[2,4,8,8], index: 17, kind: output, shape index: {1}]   ;;  %s4079_s18 = inlined_call_operand.hbm [shape: f32[2,4,8,8], index: 18, kind: output, shape index: {2}]  }
   0x1   :  { %4114 = sst [smem:[#allocation35_spill]] %s4061_s0 }
   0x2   :  { %4115 = sst [smem:[#allocation36_spill]] %s4062_s1 }
   0x3   :  { %4116 = sst [smem:[#allocation37_spill]] %s4063_s2 }
   0x4   :  { %4117 = sst [smem:[#allocation38_spill]] %s4064_s3 }
   0x5   :  { %4118 = sst [smem:[#allocation39_spill]] %s4066_s5 }
   0x6   :  { %4119 = sst [smem:[#allocation40_spill]] %s4068_s7 }
   0x7   :  { %4120 = sst [smem:[#allocation41_spill]] %s4071_s10 }
   0x8   :  { %4121 = sst [smem:[#allocation42_spill]] %s4072_s11 }
   0x9   :  { %4122 = sst [smem:[#allocation43_spill]] %s4073_s12 }
   0xa   :  { %4123 = sst [smem:[#allocation44_spill]] %s4074_s13 }
   0xb   :  { %4124 = sst [smem:[#allocation45_spill]] %s4076_s15 }
   0xc   :  { %4125 = sst [smem:[#allocation46_spill]] %s4077_s16 }
   0xd   :  { %4126 = sst [smem:[#allocation47_spill]] %s4078_s17 }
   0xe   :  { %4127 = sst [smem:[#allocation48_spill]] %s4079_s18 }
   0xf   :  { %24 = vsyncpa [#allocation3], 0 }
  0x10   :  { %26 = vsyncpa [#allocation3 + $0x1], 0 }
  0x11   :  { %27 = vsyncpa [#allocation6], 0 }
  0x12   :  { %29 = vsyncpa [#allocation6 + $0x1], 0 }
  0x13   :  { %30 = vsyncpa [#allocation9], 0 }
  0x14   :  { %31 = vsyncpa [#allocation12], 0 }
  0x15   :  { %32 = vsyncpa [#allocation15], 0 }
  0x16   :  { %33 = vsyncpa [#allocation4], 0 }
  0x17   :  { %35 = vsyncpa [#allocation4 + $0x1], 0 }
  0x18   :  { %36 = vsyncpa [#allocation18], 0 }
  0x19   :  { %38 = vsyncpa [#allocation18 + $0x1], 0  ;;  %s3411_s27 = smov 0   ;;  %s3413_s28 = smov 0  }
  0x1a   :  { %s3415_s29 = smov 0   ;;  %s3417_s30 = smov 0  }
  0x1b   :  { %s3419_s0 = smov 0   ;;  %s3421_s19 = smov 0  }
  0x1c LB: > { %4128 = sst [smem:[#allocation27_spill]] %s3271_s27  ;;  %s3442_s1 = sadd.s32 4294967295, %s3291_s19   ;;  %s3291_s19 = sphi %s3421_s19, %s44_s19   ;;  %s3287_s0 = sphi %s3419_s0, %s4189_s0   ;;  %s3283_s30 = sphi %s3417_s30, %s4188_s30   ;;  %s3279_s29 = sphi %s3415_s29, %s4192_s29   ;;  %s3275_s28 = sphi %s3413_s28, %s4191_s28   ;;  %s3271_s27 = sphi %s3411_s27, %s4190_s27  }
  0x1d   : > { %4129 = sst [smem:[#allocation28_spill]] %s3283_s30  ;;  %p2435_p0 = scmp.ge.s32.totalorder %s3291_s19, 1 }
  0x1e   : > { %4130 = sst [smem:[#allocation29_spill]] %s3287_s0  ;;  %p4098_p1 = scmp.eq.s32.totalorder %s3442_s1, 0 }
  0x1f   : > { %4131 = sst [smem:[#allocation30_spill]] %s3291_s19  ;;  %p498_p2 = scmp.lt.s32.totalorder %s3291_s19, 3 }
  0x20   : > { %s3293_s21 = smov [#allocation8]   ;;  %s3294_s23 = smov [#allocation11]  }
  0x21   : > { %p3447_p3 = pnand %p2435_p0, %p498_p2  ;;  %s510_s22 = sshll.u32 %s3293_s21, 4  ;;  %s3451_s22 = int_to_ptr.vmem [resolvable:$true] %s510_s22 }
  0x22   : > { %s542_s24 = sshll.u32 %s3294_s23, 4  ;;  %s4134_s3 = sld [smem:[#allocation38_spill]]  ;;  %s3462_s24 = int_to_ptr.vmem [resolvable:$true] %s542_s24 }
  0x23   : > { %s4132_s20 = scalar_select %p3447_p3, 1, 0 }
  0x24   : > { %p2770_p4 = pneg %p3447_p3 }
  0x26   : > { %p3458_p6 = pnand %p2770_p4, %p4098_p1 }
  0x28   : > { %s4133_s2 = scalar_select %p3458_p6, 1, 0 }
  0x29   : > { %s2903_s16 = scalar_lea.hbm %s4134_s3, 512  ;;  %p3472_p8 = pneg %p3458_p6 }
  0x2a   : > { %p2904_p7 = scmp.ne.s32.totalorder %s4134_s3, %s2903_s16  ;;  %p2910_p11 = scmp.lt.u32.totalorder %s2903_s16, %s4134_s3 }
  0x2b   : > { %s4135_s18 = scalar_select %p3472_p8, 1, 0 }
  0x2c   : > { %p2906_p9 = pnand %p3472_p8, %p2904_p7 }
  0x2e   : > { %p2907_p10 = pneg %p2906_p9 }
  0x30   : > { %p2912_p12 = pnand %p2910_p11, %p2907_p10 }
  0x32   : > { %2915 = shalt.err (!%p2912_p12)
}
  0x33   : > { %s2916_s15 = scalar_lea.vmem %s3451_s22, 512  ;;  %p2924_p4 = scmp.lt.s32.totalorder %s3451_s22, %s3451_s22 }
  0x34   : > { %p2917_p13 = scmp.ne.s32.totalorder %s3451_s22, %s2916_s15  ;;  %p2925_p5 = scmp.lt.s32.totalorder %s2916_s15, %s2916_s15 }
  0x36   : > { %p2919_p0 = pnand %p2917_p13, %p3472_p8  ;;  %p2926_p7 = por %p2925_p5, %p2924_p4 }
  0x38   : > { %p2920_p2 = pneg %p2919_p0 }
  0x3a   : > { %p2927_p9 = pnand %p2926_p7, %p2920_p2 }
  0x3c   : > { %2930 = shalt.err (!%p2927_p9)
}
  0x3d   : > { %s4087_s25 = smov 128   ;;  %s4090_s16 = smov 8  }
  0x3e   : > { %2773 = dma.hbm_to_vmem [thread:$0]  (!%p3458_p6), %s4134_s3, 512, %s3451_s22, [#allocation9], %s4087_s25, %s4087_s25, %s4090_s16  }
  0x3f   : > { %s4136_s7 = sld [smem:[#allocation40_spill]] }
  0x45   : > { %s2931_s15 = scalar_lea.hbm %s4136_s7, 512 }
  0x46   : > { %p2932_p5 = scmp.ne.s32.totalorder %s4136_s7, %s2931_s15  ;;  %p2938_p12 = scmp.lt.u32.totalorder %s2931_s15, %s4136_s7 }
  0x48   : > { %p2934_p10 = pnand %p2932_p5, %p3472_p8 }
  0x4a   : > { %p2935_p11 = pneg %p2934_p10 }
  0x4c   : > { %p2940_p13 = pnand %p2938_p12, %p2935_p11 }
  0x4e   : > { %2943 = shalt.err (!%p2940_p13)
}
  0x4f   : > { %s2944_s22 = scalar_lea.vmem %s3462_s24, 512  ;;  %p2952_p7 = scmp.lt.s32.totalorder %s3462_s24, %s3462_s24 }
  0x50   : > { %p2945_p0 = scmp.ne.s32.totalorder %s3462_s24, %s2944_s22  ;;  %p2953_p9 = scmp.lt.s32.totalorder %s2944_s22, %s2944_s22 }
  0x52   : > { %p2947_p2 = pnand %p2945_p0, %p3472_p8  ;;  %p2954_p5 = por %p2953_p9, %p2952_p7 }
  0x54   : > { %p2948_p4 = pneg %p2947_p2 }
  0x56   : > { %p2955_p10 = pnand %p2954_p5, %p2948_p4 }
  0x58   : > { %2958 = shalt.err (!%p2955_p10)
}
  0x59   : > { %2779 = dma.hbm_to_vmem [thread:$0]  (!%p3458_p6), %s4136_s7, 512, %s3462_s24, [#allocation12], %s4087_s25, %s4087_s25, %s4090_s16  }
  0x5a   : > { %s4089_s13 = sadd.s32 4294967294, %s3291_s19   ;;  %s56_s30 = sadd.s32 1, %s3287_s0 }
  0x5b   : > { %p58_p11 = scmp.ge.s32.totalorder %s56_s30, 2  ;;  %s65_s17 = sadd.s32 1, %s3279_s29 }
  0x5c   : > { %p72_p12 = scmp.ne.s32.totalorder %s3279_s29, %s3275_s28  ;;  %p73_p13 = scmp.eq.s32.totalorder %s3291_s19, 0 }
  0x5d   : > { %s4194_s30 = smov (%p58_p11, %s56_s30), 0  ;;  %p78_p2 = scmp.ne.s32.totalorder %s3275_s28, %s3271_s27 }
  0x5e   : > { %4137 = sst [smem:[#allocation31_spill]] %s4194_s30  ;;  %p3530_p0 = por %p73_p13, %p72_p12 }
  0x5f   : > { %s60_s24 = ssub.s32 %s3287_s0, %s4194_s30  ;;  %p429_p4 = scmp.eq.s32.totalorder %s3442_s1, 1 }
  0x60   : > { %p63_p7 = scmp.eq.s32.totalorder %s60_s24, 0  ;;  %p3541_p9 = por %p4098_p1, %p78_p2 }
  0x61   : > { %p3545_p5 = por %p429_p4, %p72_p12  ;;  %p435_p10 = scmp.eq.s32.totalorder %s4089_s13, 1 }
  0x62   : > { %s4139_s21 = scalar_select %p3541_p9, 1, 0 }
  0x63   : > { %s4140_s23 = scalar_select %p3545_p5, 1, 0 }
  0x64   : > { %s3552_s15 = scalar_select %p63_p7, %s3279_s29, %s65_s17  }
  0x65   : > { %4141 = sst [smem:[#allocation32_spill]] %s4140_s23  ;;  %p3554_p11 = por %p435_p10, %p78_p2 }
  0x66   : > { %4142 = sst [smem:[#allocation33_spill]] %s3552_s15  ;;  %p2811_p13 = scmp.lt.s32.totalorder %s3291_s19, 2 }
  0x67   : > { %s4143_s22 = scalar_select %p3554_p11, 1, 0 }
  0x68   : > { %s4093_s11 = sand.u32 1, %s3279_s29   ;;  %s3561_s12 = sshll.u32 %s3287_s0, 7 }
  0x69   : > { %4144 = sst [smem:[#allocation34_spill]] %s4143_s22  ;;  %s3565_s24 = sshll.u32 %s4093_s11, 3 }
  0x6a   : > { %p3569_p12 = pnand %p2811_p13, %p3530_p0  ;;  %s617_s17 = sand.u32 1, %s3291_s19  }
  0x6b   : > { %s4146_s3 = sld [smem:[#allocation36_spill]]  ;;  %s621_s30 = scalar_lea.vmem [#allocation5], %s3565_s24 }
  0x6c   : > { %s4145_s25 = scalar_select %p3569_p12, 1, 0 }
  0x6d   : > { %s628_s11 = sshll.u32 %s621_s30, 4  ;;  %s3583_s26 = scalar_lea.sflag [#allocation6], %s617_s17  ;;  %s3581_s11 = int_to_ptr.vmem [resolvable:$true] %s628_s11 }
  0x6e   : > { %p3589_p2 = pneg %p3569_p12 }
  0x70   : > { %s4147_s15 = scalar_select %p3589_p2, 1, 0 }
  0x71   : > { %s3578_s7 = scalar_lea.hbm %s4146_s3, %s3561_s12  ;;  %s2964_s19 = scalar_lea.hbm %s4146_s3, 256 }
  0x72   : > { %s2959_s0 = scalar_lea.hbm %s3578_s7, 128  ;;  %p2965_p10 = scmp.lt.u32.totalorder %s3578_s7, %s4146_s3 }
  0x73   : > { %p2960_p0 = scmp.ne.s32.totalorder %s3578_s7, %s2959_s0  ;;  %p2966_p13 = scmp.lt.u32.totalorder %s2964_s19, %s2959_s0 }
  0x74   : > { %p2968_p11 = scmp.lt.u32.totalorder %s2959_s0, %s3578_s7 }
  0x75   : > { %p2962_p4 = pnand %p3589_p2, %p2960_p0  ;;  %p2967_p1 = por %p2966_p13, %p2965_p10 }
  0x77   : > { %p2963_p7 = pneg %p2962_p4  ;;  %p2969_p5 = por %p2968_p11, %p2967_p1 }
  0x79   : > { %p2970_p9 = pnand %p2969_p5, %p2963_p7 }
  0x7b   : > { %2973 = shalt.err (!%p2970_p9)
}
  0x7c   : > { %s2974_s17 = scalar_lea.vmem %s3581_s11, 128  ;;  %s3297_s16 = smov [#allocation5]  }
  0x7d   : > { %p2975_p0 = scmp.ne.s32.totalorder %s3581_s11, %s2974_s17  ;;  %s2979_s13 = sshll.u32 %s3297_s16, 4  ;;  %s2980_s13 = int_to_ptr.vmem [resolvable:$false] %s2979_s13 }
  0x7e   : > { %s2981_s22 = scalar_lea.vmem %s2980_s13, 256  ;;  %p2982_p6 = scmp.lt.s32.totalorder %s3581_s11, %s2980_s13 }
  0x7f   : > { %p2977_p4 = pnand %p2975_p0, %p3589_p2  ;;  %p2983_p8 = scmp.lt.s32.totalorder %s2981_s22, %s2974_s17 }
  0x81   : > { %p2978_p3 = pneg %p2977_p4  ;;  %p2984_p10 = por %p2983_p8, %p2982_p6 }
  0x83   : > { %p2985_p13 = pnand %p2984_p10, %p2978_p3 }
  0x85   : > { %2988 = shalt.err (!%p2985_p13)
}
  0x86   : > { %2792 = dma.hbm_to_vmem [thread:$0]  (!%p3569_p12), %s3578_s7, 128, %s3581_s11, %s3583_s26  }
  0x87   : > { %s3298_s0 = smov [#allocation10]   ;;  %s3299_s30 = smov [#allocation13]  }
  0x88   : > { %s526_s19 = sshll.u32 %s3298_s0, 4  ;;  %s556_s3 = sshll.u32 %s3299_s30, 4  ;;  %s527_s19 = int_to_ptr.vmem [resolvable:$true] %s526_s19  ;;  %s557_s3 = int_to_ptr.vmem [resolvable:$true] %s556_s3 }
  0x89   : > { %s4148_s5 = sld [smem:[#allocation39_spill]]  ;;  %p4149_p3 = scmp.ne.s32.totalorder %s4135_s18, 0 }
  0x8f   : > { %s2989_s13 = scalar_lea.hbm %s4148_s5, 512 }
  0x90   : > { %p2990_p1 = scmp.ne.s32.totalorder %s4148_s5, %s2989_s13  ;;  %p2996_p9 = scmp.lt.u32.totalorder %s2989_s13, %s4148_s5 }
  0x92   : > { %p2992_p6 = pnand %p2990_p1, %p4149_p3 }
  0x94   : > { %p2993_p8 = pneg %p2992_p6 }
  0x96   : > { %p2998_p5 = pnand %p2996_p9, %p2993_p8 }
  0x98   : > { %3001 = shalt.err (!%p2998_p5)
}
  0x99   : > { %s3002_s7 = scalar_lea.vmem %s527_s19, 512  ;;  %p3010_p4 = scmp.lt.s32.totalorder %s527_s19, %s527_s19 }
  0x9a   : > { %p3003_p11 = scmp.ne.s32.totalorder %s527_s19, %s3002_s7  ;;  %p3011_p10 = scmp.lt.s32.totalorder %s3002_s7, %s3002_s7 }
  0x9c   : > { %p3005_p7 = pnand %p3003_p11, %p4149_p3  ;;  %p3012_p13 = por %p3011_p10, %p3010_p4 }
  0x9e   : > { %p3006_p0 = pneg %p3005_p7 }
  0xa0   : > { %p3013_p12 = pnand %p3012_p13, %p3006_p0 }
  0xa2   : > { %3016 = shalt.err (!%p3013_p12)
}
  0xa3   : > { %p4150_p1 = scmp.ne.s32.totalorder %s4133_s2, 0  ;;  %s4151_s27 = smov 8  }
  0xa4   : > { %s4152_s11 = smov 128   ;;  %s3017_s16 = scalar_lea.hbm %s4069_s8, 16 }
  0xa5   : > { %2776 = dma.hbm_to_vmem [thread:$0]  (!%p4150_p1), %s4148_s5, 512, %s527_s19, [#allocation9], %s4152_s11, %s4152_s11, %s4151_s27  }
  0xa6   : > { %p3018_p6 = scmp.ne.s32.totalorder %s4069_s8, %s3017_s16  ;;  %p3024_p9 = scmp.lt.u32.totalorder %s3017_s16, %s4069_s8 }
  0xa8   : > { %p3020_p12 = pnand %p3018_p6, %p4149_p3 }
  0xaa   : > { %p3021_p8 = pneg %p3020_p12 }
  0xac   : > { %p3026_p5 = pnand %p3024_p9, %p3021_p8 }
  0xae   : > { %3029 = shalt.err (!%p3026_p5)
}
  0xaf   : > { %s3030_s10 = scalar_lea.vmem %s557_s3, 16  ;;  %s3037_s19 = scalar_lea.vmem %s557_s3, 32 }
  0xb0   : > { %p3031_p11 = scmp.ne.s32.totalorder %s557_s3, %s3030_s10  ;;  %p3038_p4 = scmp.lt.s32.totalorder %s557_s3, %s557_s3 }
  0xb1   : > { %p3039_p10 = scmp.lt.s32.totalorder %s3037_s19, %s3030_s10 }
  0xb2   : > { %p3033_p7 = pnand %p3031_p11, %p4149_p3 }
  0xb3   : > { %p3040_p13 = por %p3039_p10, %p3038_p4 }
  0xb4   : > { %p3034_p0 = pneg %p3033_p7 }
  0xb6   : > { %p3041_p2 = pnand %p3040_p13, %p3034_p0 }
  0xb8   : > { %3044 = shalt.err (!%p3041_p2)
}
  0xb9   : > { %2782 = dma.hbm_to_vmem [thread:$0]  (!%p4150_p1), %s4069_s8, 16, %s557_s3, [#allocation12]  }
  0xba   : > { %s3300_s30 = smov [#allocation14]   ;;  %s3045_s22 = scalar_lea.hbm %s4075_s14, 512 }
  0xbb   : > { %s581_s16 = sshll.u32 %s3300_s30, 4  ;;  %p3046_p6 = scmp.ne.s32.totalorder %s4075_s14, %s3045_s22  ;;  %s582_s16 = int_to_ptr.vmem [resolvable:$true] %s581_s16 }
  0xbc   : > { %p3052_p8 = scmp.lt.u32.totalorder %s3045_s22, %s4075_s14 }
  0xbd   : > { %p3048_p2 = pnand %p3046_p6, %p4149_p3 }
  0xbf   : > { %p3049_p12 = pneg %p3048_p2 }
  0xc1   : > { %p3054_p9 = pnand %p3052_p8, %p3049_p12 }
  0xc3   : > { %3057 = shalt.err (!%p3054_p9)
}
  0xc4   : > { %s3058_s3 = scalar_lea.vmem %s582_s16, 512  ;;  %p3066_p0 = scmp.lt.s32.totalorder %s582_s16, %s582_s16 }
  0xc5   : > { %p3059_p5 = scmp.ne.s32.totalorder %s582_s16, %s3058_s3  ;;  %p3067_p4 = scmp.lt.s32.totalorder %s3058_s3, %s3058_s3 }
  0xc7   : > { %p3061_p11 = pnand %p3059_p5, %p4149_p3  ;;  %p3068_p10 = por %p3067_p4, %p3066_p0 }
  0xc9   : > { %p3062_p7 = pneg %p3061_p11 }
  0xcb   : > { %p3069_p13 = pnand %p3068_p10, %p3062_p7 }
  0xcd   : > { %3072 = shalt.err (!%p3069_p13)
}
  0xce   : > { %2785 = dma.hbm_to_vmem [thread:$0]  (!%p4150_p1), %s4075_s14, 512, %s582_s16, [#allocation15], %s4152_s11, %s4152_s11, %s4151_s27  }
  0xcf   : > { %s4153_s30 = sld [smem:[#allocation35_spill]]  ;;  %s602_s2 = scalar_lea.vmem [#allocation2], %s3565_s24 }
  0xd0   : > { %s610_s22 = sshll.u32 %s602_s2, 4  ;;  %s4155_s7 = sand.u32 1, %s3279_s29   ;;  %s611_s22 = int_to_ptr.vmem [resolvable:$true] %s610_s22 }
  0xd1   : > { %s599_s10 = scalar_lea.sflag [#allocation3], %s4155_s7  ;;  %p4156_p6 = scmp.ne.s32.totalorder %s4147_s15, 0 }
  0xd5   : > { %s4154_s13 = smov %s4153_s30  ;;  %s3677_s17 = scalar_lea.hbm %s4153_s30, %s3561_s12 }
  0xd6   : > { %s3073_s19 = scalar_lea.hbm %s3677_s17, 128  ;;  %s3078_s16 = scalar_lea.hbm %s4154_s13, 256 }
  0xd7   : > { %p3074_p3 = scmp.ne.s32.totalorder %s3677_s17, %s3073_s19  ;;  %p3079_p1 = scmp.lt.u32.totalorder %s3677_s17, %s4154_s13 }
  0xd8   : > { %p3080_p8 = scmp.lt.u32.totalorder %s3078_s16, %s3073_s19  ;;  %p3082_p5 = scmp.lt.u32.totalorder %s3073_s19, %s3677_s17 }
  0xd9   : > { %p3076_p2 = pnand %p3074_p3, %p4156_p6 }
  0xda   : > { %p3081_p9 = por %p3080_p8, %p3079_p1 }
  0xdb   : > { %p3077_p12 = pneg %p3076_p2 }
  0xdc   : > { %p3083_p11 = por %p3082_p5, %p3081_p9 }
  0xde   : > { %p3084_p7 = pnand %p3083_p11, %p3077_p12 }
  0xe0   : > { %3087 = shalt.err (!%p3084_p7)
}
  0xe1   : > { %s3088_s23 = scalar_lea.vmem %s611_s22, 128  ;;  %s3301_s18 = smov [#allocation2]  }
  0xe2   : > { %p3089_p0 = scmp.ne.s32.totalorder %s611_s22, %s3088_s23  ;;  %s3093_s0 = sshll.u32 %s3301_s18, 4  ;;  %s3094_s0 = int_to_ptr.vmem [resolvable:$false] %s3093_s0 }
  0xe3   : > { %s3095_s30 = scalar_lea.vmem %s3094_s0, 256  ;;  %p3096_p13 = scmp.lt.s32.totalorder %s611_s22, %s3094_s0 }
  0xe4   : > { %p3091_p4 = pnand %p3089_p0, %p4156_p6  ;;  %p3097_p3 = scmp.lt.s32.totalorder %s3095_s30, %s3088_s23 }
  0xe6   : > { %p3092_p10 = pneg %p3091_p4  ;;  %p3098_p2 = por %p3097_p3, %p3096_p13 }
  0xe8   : > { %p3099_p1 = pnand %p3098_p2, %p3092_p10 }
  0xea   : > { %3102 = shalt.err (!%p3099_p1)
}
  0xeb   : > { %p4157_p8 = scmp.ne.s32.totalorder %s4145_s25, 0  ;;  %s4158_s19 = sld [smem:[#allocation37_spill]] }
  0xec   : > { %s639_s16 = scalar_lea.vmem [#allocation7], %s3565_s24 }
  0xed   : > { %2789 = dma.hbm_to_vmem [thread:$0]  (!%p4157_p8), %s3677_s17, 128, %s611_s22, %s599_s10  }
  0xee   : > { %s646_s3 = sshll.u32 %s639_s16, 4  ;;  %s647_s3 = int_to_ptr.vmem [resolvable:$true] %s646_s3 }
  0xf1   : > { %s4159_s11 = smov %s4158_s19  ;;  %s3703_s27 = scalar_lea.hbm %s4158_s19, %s3561_s12 }
  0xf2   : > { %s3103_s5 = scalar_lea.hbm %s3703_s27, 128  ;;  %s3108_s17 = scalar_lea.hbm %s4159_s11, 256 }
  0xf3   : > { %p3104_p12 = scmp.ne.s32.totalorder %s3703_s27, %s3103_s5  ;;  %p3109_p11 = scmp.lt.u32.totalorder %s3703_s27, %s4159_s11 }
  0xf4   : > { %p3110_p7 = scmp.lt.u32.totalorder %s3108_s17, %s3103_s5  ;;  %p3112_p4 = scmp.lt.u32.totalorder %s3103_s5, %s3703_s27 }
  0xf5   : > { %p3106_p9 = pnand %p3104_p12, %p4156_p6 }
  0xf6   : > { %p3111_p0 = por %p3110_p7, %p3109_p11 }
  0xf7   : > { %p3107_p5 = pneg %p3106_p9 }
  0xf8   : > { %p3113_p10 = por %p3112_p4, %p3111_p0 }
  0xfa   : > { %p3114_p13 = pnand %p3113_p10, %p3107_p5 }
  0xfc   : > { %3117 = shalt.err (!%p3114_p13)
}
  0xfd   : > { %s3118_s12 = scalar_lea.vmem %s647_s3, 128  ;;  %s3302_s24 = smov [#allocation7]  }
  0xfe   : > { %p3119_p3 = scmp.ne.s32.totalorder %s647_s3, %s3118_s12  ;;  %s3123_s0 = sshll.u32 %s3302_s24, 4  ;;  %s3124_s0 = int_to_ptr.vmem [resolvable:$false] %s3123_s0 }
  0xff   : > { %s3125_s30 = scalar_lea.vmem %s3124_s0, 256  ;;  %p3126_p12 = scmp.lt.s32.totalorder %s647_s3, %s3124_s0 }
 0x100   : > { %p3121_p2 = pnand %p3119_p3, %p4156_p6  ;;  %p3127_p9 = scmp.lt.s32.totalorder %s3125_s30, %s3118_s12 }
 0x102   : > { %p3122_p1 = pneg %p3121_p2  ;;  %p3128_p8 = por %p3127_p9, %p3126_p12 }
 0x104   : > { %p3129_p7 = pnand %p3128_p8, %p3122_p1 }
 0x106   : > { %3132 = shalt.err (!%p3129_p7)
}
 0x107   : > { %p4160_p11 = scmp.ne.s32.totalorder %s4145_s25, 0  ;;  %p4161_p5 = scmp.ne.s32.totalorder %s4132_s20, 0 }
 0x108   : > { %s3727_s15 = sand.u32 (!%p4161_p5), 1, %s3275_s28   ;;  %p4162_p6 = scmp.ne.s32.totalorder (!%p4161_p5), %s4139_s21, 0 }
 0x109   : > { %2795 = dma.hbm_to_vmem [thread:$0]  (!%p4160_p11), %s3703_s27, 128, %s647_s3, %s3583_s26  }
 0x10a   : > { %655 = sbr.rel (%p4161_p5) target bundleno = 2647 (0xa57), region = 84  ;;  %s3730_s2 = sshll.u32 (!%p4161_p5), %s3727_s15, 3 }
 0x10b   : > { %s658_s7 = scalar_lea.sflag (!%p4161_p5), [#allocation3], %s3727_s15  ;;  %s661_s19 = scalar_lea.vmem (!%p4161_p5), [#allocation2], %s3730_s2 }
 0x111   : > { %3242 = dma.done.wait (%p4162_p6), %s658_s7, 128  }
 0x112   : > { %3244 = vsyncadd (%p4162_p6), %s658_s7, 4294967168  ;;  %s666_s20 = sand.u32 1, %s3442_s1   ;;  %s670_s26 = scalar_lea.vmem [#allocation5], %s3730_s2 }
 0x113   : > { %s667_s25 = scalar_lea.sflag [#allocation6], %s666_s20 }
 0x114   : > { %3246 = dma.done.wait (%p4162_p6), %s667_s25, 256  }
 0x115   : > { %3248 = vsyncadd (%p4162_p6), %s667_s25, 4294967040  ;;  %s679_s27 = scalar_lea.vmem [#allocation7], %s3730_s2  ;;  %p4163_p8 = scmp.eq.s32.totalorder %s3442_s1, 0 }
 0x117   : > { %3250 = dma.done.wait (%p4163_p8), [#allocation9], 1024   ;;  %p4164_p0 = pmov %p4163_p8 }
 0x119   : > { %3252 = vsyncadd (%p4164_p0), [#allocation9], 4294966272  ;;  %p4165_p4 = pmov %p4164_p0 }
 0x11a   : > { %p4166_p10 = pmov %p4164_p0 }
 0x11b   : > { %3254 = dma.done.wait (%p4165_p4), [#allocation12], 528  }
 0x11c   : > { %3256 = vsyncadd (%p4166_p10), [#allocation12], 4294966768  ;;  %p4167_p13 = pmov %p4164_p0 }
 0x11d   : > { %p4168_p3 = pmov %p4164_p0 }
 0x11e   : > { %3258 = dma.done.wait (%p4167_p13), [#allocation15], 512  }
 0x11f   : > { %3260 = vsyncadd (%p4168_p3), [#allocation15], 4294966784  ;;  %v3303_v0 = vmov 0.0|0.0   ;;  %vm3304_vm0 = vmmov 0   ;;  %v3305_v1 = vmov 0.0   ;;  %v775_v2 = vld [vmem:[#allocation8] sm:$0xff] }
 0x120   : > { %2690 = vmatprep.subr.bf16.mxu0 %v3303_v0  ;;  %2696 = vmatprep.subr.bf16.mxu1 %v3303_v0  ;;  %v776_v3 = vld [vmem:[#allocation8 + $0x8] sm:$0xff]  ;;  %v777_v4 = vld [vmem:[#allocation8 + $0x10] sm:$0xff]  ;;  %v778_v6 = vld [vmem:[#allocation8 + $0x18] sm:$0xff]  ;;  %vm786_vm1 = vcmask 261120   ;;  %s4171_s3 = sld [smem:[#allocation42_spill]]  ;;  %s4172_s18 = sld [smem:[#allocation44_spill]] }
 0x121   : > { %2570 = vmatprep.mubr.msk.f32.mxu0 %vm3304_vm0, %v3305_v1  ;;  %2581 = vmatprep.mubr.msk.f32.mxu1 %vm3304_vm0, %v3305_v1  ;;  %v2691_v5 = vpack.c.bf16 %v776_v3, %v775_v2  ;;  %v860_v7 = vld [vmem:[#allocation10] sm:$0xff]  ;;  %v861_v8 = vld [vmem:[#allocation10 + $0x8] sm:$0xff]  ;;  %v862_v10 = vld [vmem:[#allocation10 + $0x10] sm:$0xff]  ;;  %v2694_v12 = vpack.c.bf16 %v778_v6, %v777_v4  ;;  %vm1365_vm2 = vcmask 64512   ;;  %s3306_s17 = smov 120   ;;  %s3307_s22 = smov 112  }
 0x122   : > { %v2697_v9 = vpack.c.bf16 %v861_v8, %v860_v7  ;;  %v863_v11 = vld [vmem:[#allocation10 + $0x18] sm:$0xff]  ;;  %v1028_v14 = vld [vmem:[%s4070_s9] sm:$0xff]  ;;  %v773_v17 = vld [vmem:[%s670_s26] sm:$0xff]  ;;  %s3308_s10 = smov 104   ;;  %s2458_s12 = sshll.u32 %s3727_s15, 5  ;;  %vm2049_vm3 = vcmask 130048  }
 0x123   : > { %2692 = vmatpush3.bf16.msra.mxu0 %v2691_v5  ;;  %v2700_v13 = vpack.c.bf16 %v863_v11, %v862_v10  ;;  %v1029_v15 = vld [vmem:[%s4070_s9 + $0x8] sm:$0xff]  ;;  %v1030_v19 = vld [vmem:[%s4070_s9 + $0x10] sm:$0xff]  ;;  %v1031_v20 = vld [vmem:[%s4070_s9 + $0x18] sm:$0xff]  ;;  %s3853_s24 = scalar_lea.vmem [#allocation19], %s2458_s12  ;;  %s3872_s0 = scalar_lea.vmem [#allocation17], %s2458_s12  ;;  %vm2051_vm4 = vcmask 195584  }
 0x124   : > { %2693 = vmatprep.subr.bf16.mxu0 %v3303_v0  ;;  %2698 = vmatpush3.bf16.msra.mxu1 %v2697_v9  ;;  %v772_v16 = vld [vmem:[%s661_s19] sm:$0xff]  ;;  %v2709_v18 = vpack.c.bf16 %v1029_v15, %v1028_v14  ;;  %v2712_v21 = vpack.c.bf16 %v1031_v20, %v1030_v19  ;;  %v944_v22 = vld [vmem:[#allocation11] sm:$0xff]  ;;  %v945_v23 = vld [vmem:[#allocation11 + $0x8] sm:$0xff]  ;;  %s4169_s19 = sld [smem:[#allocation41_spill]]  ;;  %s3309_s30 = smov 8  }
 0x125   : > { %2699 = vmatprep.subr.bf16.mxu1 %v3303_v0  ;;  %v946_v24 = vld [vmem:[#allocation11 + $0x10] sm:$0xff]  ;;  %v2703_v25 = vpack.c.bf16 %v945_v23, %v944_v22  ;;  %v947_v26 = vld [vmem:[#allocation11 + $0x18] sm:$0xff]  ;;  %v2464_v3 = vld [vmem:[#allocation13] ss:$0 sm:$0xff]  ;;  %s3310_s7 = smov 16   ;;  %s3311_s25 = smov 24  }
 0x126   : > { %v2706_v27 = vpack.c.bf16 %v947_v26, %v946_v24  ;;  %v774_v28 = vld [vmem:[%s679_s27] sm:$0xff]  ;;  %s4170_s27 = sld [smem:[#allocation43_spill]]  ;;  %s4174_s26 = sld [smem:[#allocation32_spill]] }
 0x127   : > { %2695 = vmatpush3.bf16.msra.mxu0 %v2694_v12  ;;  %v2460_v29 = vld [vmem:[%s4065_s4] ss:$0 sm:$0xff]  ;;  %s2194_s21 = sshll.u32 %s3853_s24, 4  ;;  %s4175_s23 = sld [smem:[#allocation47_spill]]  ;;  %s3967_s21 = int_to_ptr.vmem [resolvable:$true] %s2194_s21 }
 0x128   : > { %2701 = vmatpush3.bf16.msra.mxu1 %v2700_v13  ;;  %2702 = vmatprep.subr.bf16.mxu0 %v3303_v0  ;;  %v2462_v35 = vld [vmem:[%s4067_s6] ss:$0 sm:$0xff] }
 0x129   : > { %2708 = vmatprep.subr.bf16.mxu1 %v3303_v0  ;;  %v2469_v60 = vld [vmem:[%s4171_s3] ss:$0 sm:$0xff] }
 0x12a   : > { %2571 = vmatmul.mubr.msk.f32.vlgmr.msra.gmra.mrb[0].mxu0 %vm786_vm1, %v772_v16  ;;  %v2468_v55 = vld [vmem:[%s4169_s19] ss:$0 sm:$0xff]  ;;  %s4173_s19 = sld [smem:[#allocation28_spill]] }
 0x12b   : > { %2582 = vmatmul.mubr.msk.f32.vlgmr.msra.gmra.mrb[0].mxu1 %vm786_vm1, %v773_v17  ;;  %2592 = vmatprep.mubr.msk.f32.mxu0 %vm3304_vm0, %v3305_v1  ;;  %v2473_v61 = vld [vmem:[%s4172_s18] ss:$0 sm:$0xff] }
 0x12c   : > { %2710 = vmatpush3.bf16.msra.mxu1 %v2709_v18  ;;  %2603 = vmatprep.mubr.msk.f32.mxu1 %vm3304_vm0, %v3305_v1  ;;  %v2472_v58 = vld [vmem:[%s4170_s27] ss:$0 sm:$0xff]  ;;  %s2177_s27 = sshll.u32 %s3872_s0, 4  ;;  %p4176_p1 = scmp.ne.s32.totalorder %s4174_s26, 0  ;;  %s3925_s27 = int_to_ptr.vmem [resolvable:$true] %s2177_s27 }
 0x12d   : > { %2711 = vmatprep.subr.bf16.mxu1 %v3303_v0  ;;  %2704 = vmatpush3.bf16.msra.mxu0 %v2703_v25 }
 0x12e   : > { %2705 = vmatprep.subr.bf16.mxu0 %v3303_v0 }
 0x130   : > { %2713 = vmatpush3.bf16.msra.mxu1 %v2712_v21  ;;  %s2504_s16 = sshll.u32 %s4173_s19, 9 }
 0x131   : > { %2720 = vmatprep.subr.bf16.mxu1 %v3303_v0  ;;  %2707 = vmatpush3.bf16.msra.mxu0 %v2706_v27  ;;  %s3934_s18 = scalar_lea.hbm %s4175_s23, %s2504_s16 }
 0x132   : > { %2714 = vmatprep.subr.bf16.mxu0 %v3303_v0 }
 0x134   : > { %2593 = vmatmul.mubr.msk.f32.vlgmr.msra.gmra.mrb[2].mxu0 %vm786_vm1, %v774_v28 }
 0x135   : > { %2716 = vmatpush3.bf16.msra.mxu0 %v2709_v18  ;;  %2614 = vmatprep.mubr.msk.f32.mxu0 %vm3304_vm0, %v3305_v1 }
 0x136   : > { %2717 = vmatprep.subr.bf16.mxu0 %v3303_v0 }
 0x139   : > { %2719 = vmatpush3.bf16.msra.mxu0 %v2712_v21 }
 0x13a   : > { %2726 = vmatprep.subr.bf16.mxu0 %v3303_v0 }
 0x1fd   : > { %v856_v30 = vpop.f32.mrb[0].mxu0 }
 0x1fe   : > { %v857_v31 = vadd.f32 %v2460_v29, %v856_v30  ;;  %v2572_v32 = vpop.f32.mrb[1].mxu0  ;;  %v940_v33 = vpop.f32.mrb[0].mxu1 }
 0x1ff   : > { %v2583_v34 = vpop.f32.mrb[1].mxu1  ;;  %v941_v36 = vadd.f32 %v2462_v35, %v940_v33 }
 0x200   : > { %2604 = vmatmul.mubr.msk.f32.vlgmr.msra.gmra.mrb[2].mxu1 %vm786_vm1, %v857_v31 }
 0x201   : > { %2722 = vmatpush3.bf16.msra.mxu1 %v2709_v18  ;;  %2625 = vmatprep.mubr.msk.f32.mxu1 %vm3304_vm0, %v3305_v1 }
 0x202   : > { %2723 = vmatprep.subr.bf16.mxu1 %v3303_v0 }
 0x205   : > { %2725 = vmatpush3.bf16.msra.mxu1 %v2712_v21 }
 0x206   : > { %2639 = vmatprep.subr.mxu1 %v3305_v1 }
 0x207   : > { %v1024_v37 = vpop.f32.mrb[2].mxu0 }
 0x208   : > { %2626 = vmatmul.mubr.msk.f32.vlgmr.msra.gmra.mrb[4].mxu1 %vm786_vm1, %v941_v36  ;;  %v2594_v38 = vpop.f32.mrb[3].mxu0  ;;  %v3839_v5 = vadd.f32 %v2464_v3, %v1024_v37  ;;  %v2056_v3 = vld [vmem:[#allocation14 + $0x18] sm:$0xff] }
 0x209   : > { %2641 = vmatprep.mubr.msk.f32.mxu1 %vm3304_vm0, %v3305_v1 }
 0x2d3   : > { %v1103_v39 = vpop.f32.mrb[2].mxu1 }
 0x2d4   : > { %v1107_v40 = vsub.f32 %v857_v31, %v1103_v39  ;;  %v2605_v41 = vpop.f32.mrb[3].mxu1 }
 0x2d6   : > { %v1108_v42 = vmul.f32 %v1107_v40, %v1107_v40 }
 0x2d8   : > { %2615 = vmatmul.mubr.msk.f32.vlgmr.msra.gmra.mrb[4].mxu0 %vm786_vm1, %v1108_v42 }
 0x2d9   : > { %2728 = vmatpush3.bf16.msra.mxu0 %v2709_v18  ;;  %2636 = vmatprep.mubr.msk.f32.mxu0 %vm3304_vm0, %v3305_v1 }
 0x2da   : > { %2729 = vmatprep.subr.bf16.mxu0 %v3303_v0 }
 0x2db   : > { %v1270_v43 = vpop.f32.mrb[4].mxu1 }
 0x2dc   : > { %v1274_v44 = vsub.f32 %v941_v36, %v1270_v43  ;;  %v2627_v45 = vpop.f32.mrb[5].mxu1 }
 0x2dd   : > { %2731 = vmatpush3.bf16.msra.mxu0 %v2712_v21 }
 0x2de   : > { %v1275_v46 = vmul.f32 %v1274_v44, %v1274_v44  ;;  %2659 = vmatprep.subr.mxu0 %v3305_v1 }
 0x2e0   : > { %2637 = vmatmul.mubr.msk.f32.vlgmr.msra.gmra.mrb[6].mxu0 %vm786_vm1, %v1275_v46 }
 0x2e1   : > { %2661 = vmatprep.mubr.msk.f32.mxu0 %vm3304_vm0, %v3305_v1 }
 0x3ab   : > { %v1178_v47 = vpop.f32.mrb[4].mxu0 }
 0x3ac   : > { %v1179_v48 = vadd.f32 1e-05, %v1178_v47  ;;  %v2616_v49 = vpop.f32.mrb[5].mxu0 }
 0x3ae   : > { %2883 = vrsqrt.f32 %v1179_v48 }
 0x3b3   : > { %v1345_v50 = vpop.f32.mrb[6].mxu0 }
 0x3b4   : > { %v1346_v51 = vadd.f32 1e-05, %v1345_v50  ;;  %v2638_v52 = vpop.f32.mrb[7].mxu0 }
 0x3b6   : > { %2885 = vrsqrt.f32 %v1346_v51 }
 0x3b8   : > { %v2884_v53 = vpop.eup %2883 }
 0x3b9   : > { %v1183_v54 = vmul.f32 %v2884_v53, %v1107_v40 }
 0x3bb   : > { %v1190_v57 = vmul.f32 %v2468_v55, %v1183_v54 }
 0x3bd   : > { %v1197_v63 = vadd.f32 %v2469_v60, %v1190_v57 }
 0x3bf   : > { %v1198_v4 = vmul.f32 0.35355338, %v1197_v63 }
 0x3c0   : > { %v2886_v56 = vpop.eup %2885 }
 0x3c1   : > { %v1350_v59 = vmul.f32 %v2886_v56, %v1274_v44 }
 0x3c3   : > { %v1357_v62 = vmul.f32 %v2472_v58, %v1350_v59 }
 0x3c5   : > { %v1364_v2 = vadd.f32 %v2473_v61, %v1357_v62  ;;  %v2053_v61 = vld [vmem:[#allocation14] sm:$0xff]  ;;  %v2054_v62 = vld [vmem:[#allocation14 + $0x8] sm:$0xff] }
 0x3c6   : > { %v2733_v63 = vpack.c.bf16 %v2054_v62, %v2053_v61 }
 0x3c7   : > { %1530 = vrot.lane.b32.xlu1 %v1364_v2, %s3306_s17  ;;  %2640 = vmatpush3.xpose.msk.msra.mxu1 %vm1365_vm2, %v1364_v2 }
 0x3c8   : > { %2644 = vmatprep.subr.mxu1 %v3305_v1 }
 0x3ca   : > { %2642 = vmatmul.mubr.msk.f32.vlgmr.msra.gmra.mrb[6].mxu1 %vm1365_vm2, %v1198_v4 }
 0x3cb   : > { %1528 = vrot.lane.b32.xlu1 %v1198_v4, %s3306_s17  ;;  %2645 = vmatpush3.msra.mxu1 %v3839_v5 }
 0x3cc   : > { %2646 = vmatprep.mubr.msk.f32.mxu1 %vm3304_vm0, %v3305_v1  ;;  %2649 = vmatprep.subr.mxu1 %v3305_v1 }
 0x3cf   : > { %1698 = vrot.lane.b32.xlu1 %v1198_v4, %s3307_s22 }
 0x3d3   : > { %1869 = vrot.lane.b32.xlu1 %v1364_v2, %s3308_s10 }
 0x3d7   : > { %1867 = vrot.lane.b32.xlu1 %v1198_v4, %s3308_s10 }
 0x439   : > { %v1531_v14 = vpop.permute.xlu1 %1530 }
 0x43d   : > { %v1529_v15 = vpop.permute.xlu1 %1528 }
 0x441   : > { %v1699_v16 = vpop.permute.xlu1 %1698 }
 0x445   : > { %v1870_v19 = vpop.permute.xlu1 %1869 }
 0x449   : > { %v1868_v21 = vpop.permute.xlu1 %1867 }
 0x49d   : > { %v1438_v6 = vpop.f32.mrb[6].mxu1 }
 0x49e   : > { %1442 = vst.msk [vmem:[%s3853_s24] sm:$0xff] %vm1365_vm2, %v1438_v6  ;;  %v2643_v7 = vpop.f32.mrb[7].mxu1  ;;  %v1443_v8 = vsel %vm1365_vm2, %v1438_v6, -inf }
 0x49f   : > { %1444 = vmax.xlane.f32.xlu0 %v1443_v8 }
 0x52c   : > { %v1445_v9 = vpop.xlane.xlu0 %1444 }
 0x52d   : > { %v1446_v10 = vsub.f32 %v1438_v6, %v1445_v9 }
 0x52f   : > { %v1447_v11 = vmul.f32 1.442695, %v1446_v10 }
 0x531   : > { %2887 = vpow2.f32 %v1447_v11 }
 0x53b   : > { %v2888_v12 = vpop.eup %2887 }
 0x53c   : > { %v1449_v13 = vsel %vm1365_vm2, %v2888_v12, 0.0 }
 0x53d   : > { %1450 = vadd.xlane.f32.xlu0 %v1449_v13 }
 0x553   : > { %1700 = vrot.lane.b32.xlu0 %v1364_v2, %s3307_s22  ;;  %v2055_v2 = vld [vmem:[#allocation14 + $0x10] sm:$0xff] }
 0x554   : > { %v2736_v4 = vpack.c.bf16 %v2056_v3, %v2055_v2 }
 0x5ca   : > { %v1451_v17 = vpop.xlane.xlu0 %1450 }
 0x5cb   : > { %2889 = vrcp.f32 %v1451_v17 }
 0x5ce   : > { %v1701_v18 = vpop.permute.xlu0 %1700 }
 0x5cf   : > { %2660 = vmatpush3.xpose.msk.msra.mxu0 %vm1365_vm2, %v1701_v18 }
 0x5d0   : > { %2669 = vmatprep.subr.mxu0 %v3305_v1 }
 0x5d2   : > { %2662 = vmatmul.mubr.msk.f32.vlgmr.msra.gmra.mrb[8].mxu0 %vm1365_vm2, %v1699_v16 }
 0x5d3   : > { %2670 = vmatpush3.xpose.msk.msra.mxu0 %vm1365_vm2, %v1870_v19  ;;  %2671 = vmatprep.mubr.msk.f32.mxu0 %vm3304_vm0, %v3305_v1 }
 0x5d4   : > { %2732 = vmatprep.subr.bf16.mxu0 %v3303_v0 }
 0x5d5   : > { %v2890_v20 = vpop.eup %2889 }
 0x5d6   : > { %v1453_v22 = vmul.f32 %v2890_v20, %v2888_v12  ;;  %2672 = vmatmul.mubr.msk.f32.vlgmr.msra.gmra.mrb[10].mxu0 %vm1365_vm2, %v1868_v21 }
 0x5d7   : > { %2687 = vmatprep.mubr.msk.f32.mxu0 %vm3304_vm0, %v3305_v1  ;;  %2734 = vmatpush3.bf16.msra.mxu0 %v2733_v63 }
 0x5d8   : > { %1454 = vst.msk [vmem:[%s3872_s0] sm:$0xff] %vm1365_vm2, %v1453_v22  ;;  %2647 = vmatmul.mubr.msk.f32.vlgmr.msra.gmra.mrb[8].mxu1 %vm1365_vm2, %v1453_v22  ;;  %2735 = vmatprep.subr.bf16.mxu0 %v3303_v0 }
 0x5d9   : > { %2650 = vmatpush3.xpose.msk.msra.mxu1 %vm1365_vm2, %v1531_v14  ;;  %2651 = vmatprep.mubr.msk.f32.mxu1 %vm3304_vm0, %v3305_v1 }
 0x5da   : > { %2654 = vmatprep.subr.mxu1 %v3305_v1 }
 0x5db   : > { %2737 = vmatpush3.bf16.msra.mxu0 %v2736_v4 }
 0x5dc   : > { %2652 = vmatmul.mubr.msk.f32.vlgmr.msra.gmra.mrb[10].mxu1 %vm1365_vm2, %v1529_v15 }
 0x5dd   : > { %2656 = vmatprep.mubr.msk.f32.mxu1 %vm3304_vm0, %v3305_v1 }
 0x6a5   : > { %v1772_v23 = vpop.f32.mrb[8].mxu0 }
 0x6a6   : > { %2484 = vst.msk [vmem:[%s3853_s24 + $0x10] sm:$0xff] %vm1365_vm2, %v1772_v23  ;;  %v2663_v24 = vpop.f32.mrb[9].mxu0  ;;  %v1778_v25 = vsel %vm1365_vm2, %v1772_v23, -inf }
 0x6a7   : > { %1779 = vmax.xlane.f32.xlu0 %v1778_v25 }
 0x6a9   : > { %v1941_v26 = vpop.f32.mrb[10].mxu0 }
 0x6aa   : > { %2489 = vst.msk [vmem:[%s3853_s24 + $0x18] sm:$0xff] %vm1365_vm2, %v1941_v26  ;;  %v2673_v27 = vpop.f32.mrb[11].mxu0  ;;  %v1947_v33 = vsel %vm1365_vm2, %v1941_v26, -inf }
 0x6ab   : > { %v3889_v28 = vpop.f32.mrb[8].mxu1 }
 0x6ac   : > { %v2648_v29 = vpop.f32.mrb[9].mxu1 }
 0x6af   : > { %v1602_v30 = vpop.f32.mrb[10].mxu1 }
 0x6b0   : > { %2479 = vst.msk [vmem:[%s3853_s24 + $0x8] sm:$0xff] %vm1365_vm2, %v1602_v30  ;;  %v2653_v31 = vpop.f32.mrb[11].mxu1  ;;  %v1608_v32 = vsel %vm1365_vm2, %v1602_v30, -inf }
 0x6b1   : > { %1609 = vmax.xlane.f32.xlu1 %v1608_v32 }
 0x6b5   : > { %1948 = vmax.xlane.f32.xlu1 %v1947_v33 }
 0x734   : > { %v1780_v34 = vpop.xlane.xlu0 %1779 }
 0x735   : > { %v1781_v35 = vsub.f32 %v1772_v23, %v1780_v34 }
 0x737   : > { %v1782_v36 = vmul.f32 1.442695, %v1781_v35 }
 0x739   : > { %2891 = vpow2.f32 %v1782_v36 }
 0x73e   : > { %v1610_v37 = vpop.xlane.xlu1 %1609 }
 0x73f   : > { %v1611_v45 = vsub.f32 %v1602_v30, %v1610_v37 }
 0x741   : > { %v1612_v46 = vmul.f32 1.442695, %v1611_v45 }
 0x742   : > { %v1949_v38 = vpop.xlane.xlu1 %1948 }
 0x743   : > { %v2892_v39 = vpop.eup %2891  ;;  %v1950_v40 = vsub.f32 %v1941_v26, %v1949_v38 }
 0x744   : > { %v1784_v41 = vsel %vm1365_vm2, %v2892_v39, 0.0 }
 0x745   : > { %v1951_v42 = vmul.f32 1.442695, %v1950_v40  ;;  %1785 = vadd.xlane.f32.xlu0 %v1784_v41 }
 0x747   : > { %2893 = vpow2.f32 %v1951_v42 }
 0x748   : > { %2895 = vpow2.f32 %v1612_v46 }
 0x751   : > { %v2894_v43 = vpop.eup %2893 }
 0x752   : > { %v1953_v44 = vsel %vm1365_vm2, %v2894_v43, 0.0  ;;  %v2896_v47 = vpop.eup %2895 }
 0x753   : > { %1954 = vadd.xlane.f32.xlu1 %v1953_v44  ;;  %v1614_v48 = vsel %vm1365_vm2, %v2896_v47, 0.0 }
 0x75b   : > { %1622 = vrot.lane.b32.xlu0 %v3839_v5, %s3306_s17  ;;  %s3938_s17 = scalar_lea.sflag [#allocation18], %s666_s20 }
 0x764   : > { %1791 = vrot.lane.b32.xlu1 %v3839_v5, %s3307_s22  ;;  %s3133_s22 = scalar_lea.vmem %s3925_s27, 512 }
 0x765   : > { %p3134_p2 = scmp.ne.s32.totalorder %s3925_s27, %s3133_s22 }
 0x767   : > { %p3135_p12 = pnand %p3134_p2, %p4176_p1 }
 0x769   : > { %p3136_p9 = pneg %p3135_p12 }
 0x788   : > { %1615 = vadd.xlane.f32.xlu1 %v1614_v48 }
 0x799   : > { %1960 = vrot.lane.b32.xlu1 %v3839_v5, %s3308_s10  ;;  %s3312_s10 = smov [#allocation17]  }
 0x79a   : > { %s3137_s12 = sshll.u32 %s3312_s10, 4  ;;  %s3138_s12 = int_to_ptr.vmem [resolvable:$false] %s3137_s12 }
 0x79b   : > { %p3140_p7 = scmp.lt.s32.totalorder %s3925_s27, %s3138_s12 }
 0x7d2   : > { %v1786_v49 = vpop.xlane.xlu0 %1785 }
 0x7d3   : > { %2897 = vrcp.f32 %v1786_v49 }
 0x7d6   : > { %v1623_v50 = vpop.permute.xlu0 %1622 }
 0x7d7   : > { %2655 = vmatpush3.msra.mxu1 %v1623_v50 }
 0x7d8   : > { %2664 = vmatprep.subr.mxu1 %v3305_v1 }
 0x7dd   : > { %v2898_v51 = vpop.eup %2897 }
 0x7de   : > { %v1788_v52 = vmul.f32 %v2898_v51, %v2892_v39 }
 0x7e0   : > { %2485 = vst.msk [vmem:[%s3872_s0 + $0x10] sm:$0xff] %vm1365_vm2, %v1788_v52  ;;  %v1955_v53 = vpop.xlane.xlu1 %1954 }
 0x7e1   : > { %2899 = vrcp.f32 %v1955_v53 }
 0x7e4   : > { %v1792_v56 = vpop.permute.xlu1 %1791 }
 0x7eb   : > { %v2900_v54 = vpop.eup %2899 }
 0x7ec   : > { %v1957_v55 = vmul.f32 %v2900_v54, %v2894_v43 }
 0x7ee   : > { %2490 = vst.msk [vmem:[%s3872_s0 + $0x18] sm:$0xff] %vm1365_vm2, %v1957_v55 }
 0x815   : > { %v1616_v57 = vpop.xlane.xlu1 %1615 }
 0x816   : > { %2901 = vrcp.f32 %v1616_v57 }
 0x819   : > { %v1961_v60 = vpop.permute.xlu1 %1960 }
 0x820   : > { %v2902_v58 = vpop.eup %2901 }
 0x821   : > { %v1618_v59 = vmul.f32 %v2902_v58, %v2896_v47 }
 0x823   : > { %2480 = vst.msk [vmem:[%s3872_s0 + $0x8] sm:$0xff] %vm1365_vm2, %v1618_v59  ;;  %2657 = vmatmul.mubr.msk.f32.vlgmr.msra.gmra.mrb[12].mxu1 %vm1365_vm2, %v1618_v59  ;;  %s3139_s0 = scalar_lea.vmem %s3138_s12, 1024 }
 0x824   : > { %2665 = vmatpush3.msra.mxu1 %v1792_v56  ;;  %2666 = vmatprep.mubr.msk.f32.mxu1 %vm3304_vm0, %v3305_v1  ;;  %p3141_p11 = scmp.lt.s32.totalorder %s3139_s0, %s3133_s22 }
 0x825   : > { %2674 = vmatprep.subr.mxu1 %v3305_v1 }
 0x826   : > { %p3142_p5 = por %p3141_p11, %p3140_p7 }
 0x827   : > { %2667 = vmatmul.mubr.msk.f32.vlgmr.msra.gmra.mrb[14].mxu1 %vm1365_vm2, %v1788_v52 }
 0x828   : > { %2675 = vmatpush3.msra.mxu1 %v1961_v60  ;;  %2676 = vmatprep.mubr.msk.f32.mxu1 %vm3304_vm0, %v3305_v1  ;;  %p3143_p6 = pnand %p3142_p5, %p3136_p9 }
 0x82b   : > { %2677 = vmatmul.mubr.msk.f32.vlgmr.msra.gmra.mrb[16].mxu1 %vm1365_vm2, %v1957_v55 }
 0x8f6   : > { %v1694_v5 = vpop.f32.mrb[12].mxu1 }
 0x8f7   : > { %2037 = vrot.lane.b32.xlu0 %v1694_v5, %s3309_s30  ;;  %v2658_v6 = vpop.f32.mrb[13].mxu1 }
 0x8fa   : > { %v1863_v7 = vpop.f32.mrb[14].mxu1 }
 0x8fb   : > { %2041 = vrot.lane.b32.xlu1 %v1863_v7, %s3310_s7  ;;  %v2668_v1 = vpop.f32.mrb[15].mxu1 }
 0x8fe   : > { %v2032_v8 = vpop.f32.mrb[16].mxu1 }
 0x8ff   : > { %2045 = vrot.lane.b32.xlu0 %v2032_v8, %s3311_s25  ;;  %v2678_v0 = vpop.f32.mrb[17].mxu1 }
 0x969   : > { %v2038_v9 = vpop.permute.xlu0 %2037 }
 0x96a   : > { %v2048_v11 = vsel %vm1365_vm2, %v3889_v28, %v2038_v9 }
 0x96d   : > { %v2042_v10 = vpop.permute.xlu1 %2041 }
 0x96e   : > { %v2050_v12 = vsel %vm2049_vm3, %v2048_v11, %v2042_v10 }
 0x971   : > { %v2046_v13 = vpop.permute.xlu0 %2045 }
 0x972   : > { %v2052_v14 = vsel %vm2051_vm4, %v2050_v12, %v2046_v13 }
 0x973   : > { %2688 = vmatmul.mubr.msk.f32.vlgmr.msra.gmra.mrb[12].mxu0 %vm786_vm1, %v2052_v14 }
 0x974   : > { %3146 = shalt.err (!%p3143_p6)
}
 0x975   : > { %s3147_s1 = scalar_lea.hbm %s3934_s18, 512  ;;  %s3151_s25 = scalar_lea.hbm %s4175_s23, 1024 }
 0x976   : > { %p3148_p8 = scmp.ne.s32.totalorder %s3934_s18, %s3147_s1  ;;  %p3152_p10 = scmp.lt.u32.totalorder %s3934_s18, %s4175_s23 }
 0x977   : > { %p3153_p13 = scmp.lt.u32.totalorder %s3151_s25, %s3147_s1  ;;  %p3155_p2 = scmp.lt.u32.totalorder %s3147_s1, %s3934_s18 }
 0x978   : > { %p3149_p0 = pnand %p3148_p8, %p4176_p1 }
 0x979   : > { %p3154_p3 = por %p3153_p13, %p3152_p10 }
 0x97a   : > { %p3150_p4 = pneg %p3149_p0 }
 0x97b   : > { %p3156_p12 = por %p3155_p2, %p3154_p3 }
 0x97d   : > { %p3157_p9 = pnand %p3156_p12, %p3150_p4 }
 0x97f   : > { %3160 = shalt.err (!%p3157_p9)
}
 0x980   : > { %s3313_s22 = smov 128   ;;  %s4177_s0 = sld [smem:[#allocation48_spill]] }
 0x981   : > { %2765 = dma.vmem_to_hbm [thread:$0]  (%p4176_p1), %s3925_s27, 512, %s3934_s18, %s3938_s17, %s3313_s22, %s3313_s22, %s3309_s30  }
 0x982   : > { %s3161_s7 = scalar_lea.vmem %s3967_s21, 512  ;;  %s3314_s25 = smov [#allocation19]  }
 0x983   : > { %p3162_p7 = scmp.ne.s32.totalorder %s3967_s21, %s3161_s7  ;;  %s3165_s3 = sshll.u32 %s3314_s25, 4  ;;  %s3166_s3 = int_to_ptr.vmem [resolvable:$false] %s3165_s3 }
 0x984   : > { %s3167_s24 = scalar_lea.vmem %s3166_s3, 1024  ;;  %p3168_p6 = scmp.lt.s32.totalorder %s3967_s21, %s3166_s3 }
 0x985   : > { %p3163_p11 = pnand %p3162_p7, %p4176_p1  ;;  %p3169_p8 = scmp.lt.s32.totalorder %s3167_s24, %s3161_s7 }
 0x986   : > { %s4178_s1 = smov %s4177_s0  ;;  %s3974_s20 = scalar_lea.hbm %s4177_s0, %s2504_s16 }
 0x987   : > { %p3164_p5 = pneg %p3163_p11  ;;  %p3170_p0 = por %p3169_p8, %p3168_p6 }
 0x989   : > { %p3171_p4 = pnand %p3170_p0, %p3164_p5 }
 0x98b   : > { %3174 = shalt.err (!%p3171_p4)
}
 0x98c   : > { %s3175_s27 = scalar_lea.hbm %s3974_s20, 512  ;;  %s3179_s5 = scalar_lea.hbm %s4178_s1, 1024 }
 0x98d   : > { %p3176_p10 = scmp.ne.s32.totalorder %s3974_s20, %s3175_s27  ;;  %p3180_p2 = scmp.lt.u32.totalorder %s3974_s20, %s4178_s1 }
 0x98e   : > { %p3181_p12 = scmp.lt.u32.totalorder %s3179_s5, %s3175_s27  ;;  %p3183_p7 = scmp.lt.u32.totalorder %s3175_s27, %s3974_s20 }
 0x98f   : > { %p3177_p13 = pnand %p3176_p10, %p4176_p1 }
 0x990   : > { %p3182_p9 = por %p3181_p12, %p3180_p2 }
 0x991   : > { %p3178_p3 = pneg %p3177_p13 }
 0x992   : > { %p3184_p11 = por %p3183_p7, %p3182_p9 }
 0x994   : > { %p3185_p5 = pnand %p3184_p11, %p3178_p3 }
 0x996   : > { %3188 = shalt.err (!%p3185_p5)
}
 0x997   : > { %2766 = dma.vmem_to_hbm [thread:$0]  (%p4176_p1), %s3967_s21, 512, %s3974_s20, %s3938_s17, %s3313_s22, %s3313_s22, %s3309_s30  }
 0x998   : > { %s4179_s25 = sld [smem:[#allocation45_spill]]  ;;  %s2497_s3 = sshll.u32 %s4173_s19, 7 }
 0x999   : > { %s757_s24 = scalar_lea.vmem [#allocation16], %s3730_s2  ;;  %s4180_s5 = sld [smem:[#allocation46_spill]] }
 0x99a   : > { %s2163_s27 = sshll.u32 %s757_s24, 4  ;;  %s2139_s30 = scalar_lea.sflag [#allocation4], %s3727_s15  ;;  %s4011_s27 = int_to_ptr.vmem [resolvable:$true] %s2163_s27 }
 0x99b   : > { %s3189_s21 = scalar_lea.vmem %s4011_s27, 128  ;;  %s3315_s2 = smov [#allocation16]  }
 0x99c   : > { %p3190_p6 = scmp.ne.s32.totalorder %s4011_s27, %s3189_s21  ;;  %s3193_s19 = sshll.u32 %s3315_s2, 4  ;;  %s3194_s19 = int_to_ptr.vmem [resolvable:$false] %s3193_s19 }
 0x99d   : > { %s3195_s17 = scalar_lea.vmem %s3194_s19, 256  ;;  %p3196_p4 = scmp.lt.s32.totalorder %s4011_s27, %s3194_s19 }
 0x99e   : > { %v2492_v15 = vld [vmem:[%s4179_s25] ss:$0 sm:$0xff]  ;;  %p3191_p8 = pnand %p3190_p6, %p4176_p1  ;;  %p3197_p10 = scmp.lt.s32.totalorder %s3195_s17, %s3189_s21 }
 0x99f   : > { %s4009_s10 = scalar_lea.hbm %s4180_s5, %s2497_s3 }
 0x9a0   : > { %p3192_p0 = pneg %p3191_p8  ;;  %p3198_p13 = por %p3197_p10, %p3196_p4 }
 0x9a2   : > { %p3199_p3 = pnand %p3198_p13, %p3192_p0 }
 0xa46   : > { %v2133_v16 = vpop.f32.mrb[12].mxu0 }
 0xa47   : > { %v2134_v17 = vadd.f32 %v2492_v15, %v2133_v16  ;;  %v2689_v18 = vpop.f32.mrb[13].mxu0 }
 0xa49   : > { %2137 = vst.msk [vmem:[%s757_s24] sm:$0xff] %vm786_vm1, %v2134_v17 }
 0xa4a   : > { %3202 = shalt.err (!%p3199_p3)
}
 0xa4b   : > { %s3203_s15 = scalar_lea.hbm %s4009_s10, 128  ;;  %s3207_s12 = scalar_lea.hbm %s4180_s5, 256 }
 0xa4c   : > { %p3204_p2 = scmp.ne.s32.totalorder %s4009_s10, %s3203_s15  ;;  %p3208_p7 = scmp.lt.u32.totalorder %s4009_s10, %s4180_s5 }
 0xa4d   : > { %p3209_p11 = scmp.lt.u32.totalorder %s3207_s12, %s3203_s15  ;;  %p3211_p6 = scmp.lt.u32.totalorder %s3203_s15, %s4009_s10 }
 0xa4e   : > { %p3205_p12 = pnand %p3204_p2, %p4176_p1 }
 0xa4f   : > { %p3210_p5 = por %p3209_p11, %p3208_p7 }
 0xa50   : > { %p3206_p9 = pneg %p3205_p12 }
 0xa51   : > { %p3212_p8 = por %p3211_p6, %p3210_p5 }
 0xa53   : > { %p3213_p0 = pnand %p3212_p8, %p3206_p9 }
 0xa55   : > { %3216 = shalt.err (!%p3213_p0)
}
 0xa56   : > { %2764 = dma.vmem_to_hbm [thread:$0]  (%p4176_p1), %s4011_s27, 128, %s4009_s10, %s2139_s30  }
 0xa57 PF: > { %s4181_s25 = sld [smem:[#allocation27_spill]]  ;;  %s4182_s3 = sld [smem:[#allocation34_spill]] }
 0xa58   : > { %s4183_s24 = sld [smem:[#allocation30_spill]] }
 0xa5d   : > { %s2209_s16 = sand.u32 1, %s4181_s25   ;;  %p4184_p4 = scmp.ne.s32.totalorder %s4182_s3, 0 }
 0xa5e   : > { %p4185_p10 = scmp.ge.s32.totalorder %s4183_s24, 2  ;;  %s2210_s18 = scalar_lea.sflag [#allocation4], %s2209_s16 }
 0xa60   : > { %p2797_p13 = pnand %p4185_p10, %p4184_p4 }
 0xa62   : > { %3262 = dma.done.wait (!%p2797_p13), %s2210_s18, 128  }
 0xa63   : > { %3264 = vsyncadd (!%p2797_p13), %s2210_s18, 4294967168  ;;  %s4186_s21 = sadd.s32 4294967294, %s4183_s24  }
 0xa64   : > { %s2218_s2 = sand.u32 1, %s4186_s21  }
 0xa65   : > { %s2219_s19 = scalar_lea.sflag [#allocation18], %s2218_s2 }
 0xa66   : > { %3266 = dma.done.wait (!%p2797_p13), %s2219_s19, 1024  }
 0xa67   : > { %3268 = vsyncadd (!%p2797_p13), %s2219_s19, 4294966272  ;;  %s44_s19 = sadd.s32 1, %s4183_s24   ;;  %s4187_s26 = sld [smem:[#allocation33_spill]] }
 0xa68   : > { %p41_p1 = scmp.ge.s32.totalorder %s44_s19, 4   ;;  %s4188_s30 = sld [smem:[#allocation29_spill]] }
 0xa69   : > { %s4189_s0 = sld [smem:[#allocation31_spill]]  ;;  %s4190_s27 = smov %s3275_s28 }
 0xa6a   : > { %s4191_s28 = smov %s3279_s29  ;;  %43 = sbr.rel (!%p41_p1) target bundleno = 28 (0x1c), region = 211 }
 0xa6d   : > { %s4192_s29 = smov %s4187_s26 }
 0xa71   :  { %2233 = vsyncpa [#allocation3], 1 }
 0xa72   :  { %2235 = vsyncpa [#allocation3 + $0x1], 1 }
 0xa73   :  { %2236 = vsyncpa [#allocation6], 1 }
 0xa74   :  { %2238 = vsyncpa [#allocation6 + $0x1], 1 }
 0xa75   :  { %2239 = vsyncpa [#allocation9], 1 }
 0xa76   :  { %2240 = vsyncpa [#allocation12], 1 }
 0xa77   :  { %2241 = vsyncpa [#allocation15], 1 }
 0xa78   :  { %2242 = vsyncpa [#allocation4], 1 }
 0xa79   :  { %2244 = vsyncpa [#allocation4 + $0x1], 1 }
 0xa7a   :  { %2245 = vsyncpa [#allocation18], 1 }
 0xa7b   :  { %2247 = vsyncpa [#allocation18 + $0x1], 1 }

</bundles_post_ra>
